<compile_context>
chip_gen: v6e
topology: v6e:2x2x1
jax: 0.10.0
libtpu: 0.0.40
codegen_flags: <defaults>
</compile_context>

<pallas_src>
import functools

import jax
import jax.numpy as jnp
from jax.experimental import pallas as pl
from jax.experimental.pallas import tpu as pltpu

_BN_EPS = 1e-5
_LANE = 128


def _round_up(x, m):
    return (x + m - 1) // m * m


# ----------------------------- kernels -----------------------------
def _conv_stats_kernel(p_ref, w_ref, o_ref, sum_ref, sq_ref):
    """Pass 1: one (tile_rows, K) x (K, 128) MXU matmul per block, plus
    per-channel sum / sumsq accumulation across the row-tile (reduction) axis."""
    acc = jnp.dot(p_ref[...], w_ref[...], preferred_element_type=jnp.float32)
    o_ref[...] = acc

    @pl.when(pl.program_id(1) == 0)
    def _init():
        sum_ref[...] = jnp.zeros_like(sum_ref)
        sq_ref[...] = jnp.zeros_like(sq_ref)

    sum_ref[...] += jnp.sum(acc, axis=0, keepdims=True)
    sq_ref[...] += jnp.sum(acc * acc, axis=0, keepdims=True)


def _make_bn_kernel(inv_count, apply_relu, has_res):
    """Pass 2: batch-stat BN (f32) + optional residual add + optional ReLU,
    lane-dense (tile_rows, 128) stores."""

    def kernel(*refs):
        if has_res:
            c_ref, sum_ref, sq_ref, g_ref, b_ref, r_ref, o_ref = refs
        else:
            c_ref, sum_ref, sq_ref, g_ref, b_ref, o_ref = refs

        acc = c_ref[...]                                   # (tile_rows, cb) f32
        mean = sum_ref[...] * inv_count                    # (1, cb)
        var = sq_ref[...] * inv_count - mean * mean        # biased, over (N,H,W)
        scale = g_ref[...] * jax.lax.rsqrt(var + _BN_EPS)
        y = (acc - mean) * scale + b_ref[...]
        if has_res:
            y = y + r_ref[...]
        if apply_relu:
            y = jnp.maximum(y, 0.0)
        o_ref[...] = y

    return kernel


# ----------------------- conv + bn stage wrapper -----------------------
def _conv_bn(x_nhwc, w_hwio, gamma, beta, *, stride, apply_relu,
             residual_nhwc=None, tile_rows=256):
    """One conv(k x k, stride) -> batch-stat BN -> [+residual] -> [relu] stage.

    x_nhwc:   (N, H, W, Cin) f32
    w_hwio:   (k, k, Cin, Cout)
    residual: optional (N, Ho, Wo, Cout) f32 added before the final ReLU.
    returns:  (N, Ho, Wo, Cout) f32
    """
    N, H, W, Cin = x_nhwc.shape
    k = w_hwio.shape[0]
    Cout = w_hwio.shape[-1]
    pad = (k - 1) // 2

    # ---- im2col in the wrapper: one lane-dense (rows, k*k*Cin) slab ----
    xp = x_nhwc if pad == 0 else jnp.pad(
        x_nhwc, ((0, 0), (pad, pad), (pad, pad), (0, 0)))
    Hp, Wp = xp.shape[1], xp.shape[2]
    Ho = (Hp - k) // stride + 1
    Wo = (Wp - k) // stride + 1
    cols = []
    for kh in range(k):
        for kw in range(k):
            cols.append(xp[:, kh: kh + (Ho - 1) * stride + 1: stride,
                             kw: kw + (Wo - 1) * stride + 1: stride, :])
    patches = jnp.stack(cols, axis=3).reshape(N * Ho * Wo, k * k * Cin)

    rows = N * Ho * Wo
    K = k * k * Cin

    tile_rows = min(tile_rows, _round_up(rows, 8))
    rows_p = _round_up(rows, tile_rows)
    Cout_p = _round_up(Cout, _LANE)
    cb = min(Cout_p, _LANE)
    n_row_tiles = rows_p // tile_rows
    n_cout_blocks = Cout_p // cb

    f32 = jnp.float32
    # Zero-pad rows (contributes nothing to sum/sumsq) and channels (lane-dense
    # 128-wide stores); slice both off at the end. MXU operands cast to bf16.
    patches = jnp.pad(patches, ((0, rows_p - rows), (0, 0))).astype(jnp.bfloat16)
    w2 = jnp.pad(w_hwio.reshape(K, Cout),
                 ((0, 0), (0, Cout_p - Cout))).astype(jnp.bfloat16)
    g2 = jnp.pad(gamma.reshape(1, Cout), ((0, 0), (0, Cout_p - Cout))).astype(f32)
    b2 = jnp.pad(beta.reshape(1, Cout), ((0, 0), (0, Cout_p - Cout))).astype(f32)

    cparams = pltpu.CompilerParams(
        dimension_semantics=("parallel", "arbitrary"),
        vmem_limit_bytes=32 * 1024 * 1024)

    # ---------------- pass 1: conv (single K = k*k*Cin matmul) + BN stats ----------------
    conv_cost = pl.CostEstimate(
        flops=2 * rows_p * K * Cout_p,
        transcendentals=0,
        bytes_accessed=patches.size * 2 + w2.size * 2 + rows_p * Cout_p * 4)

    conv_out, ch_sum, ch_sq = pl.pallas_call(
        _conv_stats_kernel,
        grid=(n_cout_blocks, n_row_tiles),
        in_specs=[pl.BlockSpec((tile_rows, K), lambda j, i: (i, 0)),
                  pl.BlockSpec((K, cb), lambda j, i: (0, j))],
        out_specs=(pl.BlockSpec((tile_rows, cb), lambda j, i: (i, j)),
                   pl.BlockSpec((1, cb), lambda j, i: (0, j)),
                   pl.BlockSpec((1, cb), lambda j, i: (0, j))),
        out_shape=(jax.ShapeDtypeStruct((rows_p, Cout_p), f32),
                   jax.ShapeDtypeStruct((1, Cout_p), f32),
                   jax.ShapeDtypeStruct((1, Cout_p), f32)),
        compiler_params=cparams,
        cost_estimate=conv_cost,
    )(patches, w2)

    # ---------------- pass 2: BN normalize (+ residual) (+ relu) ----------------
    has_res = residual_nhwc is not None
    inputs = [conv_out, ch_sum, ch_sq, g2, b2]
    in_specs = [pl.BlockSpec((tile_rows, cb), lambda j, i: (i, j)),
                pl.BlockSpec((1, cb), lambda j, i: (0, j)),
                pl.BlockSpec((1, cb), lambda j, i: (0, j)),
                pl.BlockSpec((1, cb), lambda j, i: (0, j)),
                pl.BlockSpec((1, cb), lambda j, i: (0, j))]
    if has_res:
        res2 = jnp.pad(residual_nhwc.reshape(rows, Cout).astype(f32),
                       ((0, rows_p - rows), (0, Cout_p - Cout)))
        inputs.append(res2)
        in_specs.append(pl.BlockSpec((tile_rows, cb), lambda j, i: (i, j)))

    bn_kernel = _make_bn_kernel(1.0 / rows, apply_relu, has_res)
    out_p = pl.pallas_call(
        bn_kernel,
        grid=(n_cout_blocks, n_row_tiles),
        in_specs=in_specs,
        out_specs=pl.BlockSpec((tile_rows, cb), lambda j, i: (i, j)),
        out_shape=jax.ShapeDtypeStruct((rows_p, Cout_p), f32),
        compiler_params=pltpu.CompilerParams(
            dimension_semantics=("parallel", "parallel"),
            vmem_limit_bytes=32 * 1024 * 1024),
    )(*inputs)

    return out_p[:rows, :Cout].reshape(N, Ho, Wo, Cout)


# ----------------------------- full block -----------------------------
def basic_block_forward(x_nchw, params, stride=1):
    """Forward pass of BasicBlock. Input/output: NCHW float32."""
    # TODO(synk): for chained blocks, transpose NCHW<->NHWC only at model
    # boundaries and keep activations NHWC in HBM between blocks.
    x = jnp.transpose(x_nchw, (0, 2, 3, 1)).astype(jnp.float32)        # NHWC

    out1 = _conv_bn(x, params["w1"], params["g1"], params["b1"],
                    stride=stride, apply_relu=True)

    if "w_sc" in params:
        sc = _conv_bn(x, params["w_sc"], params["g_sc"], params["b_sc"],
                      stride=stride, apply_relu=False)                 # 1x1 conv + bn
    else:
        sc = x                                                         # identity shortcut

    out2 = _conv_bn(out1, params["w2"], params["g2"], params["b2"],
                    stride=1, apply_relu=True, residual_nhwc=sc)       # bn2 + add + relu

    return jnp.transpose(out2, (0, 3, 1, 2))                           # back to NCHW


def init_params(key, in_planes, planes, stride):
    """Deterministic synthetic parameters (shapes match the nn.Module __init__)."""
    ks = jax.random.split(key, 10)

    def conv_w(kk, cout, cin, ksz):
        # generate in PyTorch (cout, cin, kh, kw) layout, store as HWIO
        w = jax.random.normal(kk, (cout, cin, ksz, ksz), jnp.float32) * 0.1
        return jnp.transpose(w, (2, 3, 1, 0))

    def bn_p(kg, kb, c):
        g = 1.0 + 0.1 * jax.random.normal(kg, (1, c), jnp.float32)
        b = 0.1 * jax.random.normal(kb, (1, c), jnp.float32)
        return g, b

    p = {}
    p["w1"] = conv_w(ks[0], planes, in_planes, 3)
    p["g1"], p["b1"] = bn_p(ks[1], ks[2], planes)
    p["w2"] = conv_w(ks[3], planes, planes, 3)
    p["g2"], p["b2"] = bn_p(ks[4], ks[5], planes)
    if stride != 1 or in_planes != planes:
        p["w_sc"] = conv_w(ks[6], planes, in_planes, 1)
        p["g_sc"], p["b_sc"] = bn_p(ks[7], ks[8], planes)
    return p


# ------------------- pure-JAX reference (for sanity) -------------------
def _ref_conv(x, w, stride, padding):
    # bf16 operands + f32 accumulation, matching the kernel's MXU path.
    return jax.lax.conv_general_dilated(
        x.astype(jnp.bfloat16), w.astype(jnp.bfloat16),
        (stride, stride), padding,
        dimension_numbers=("NHWC", "HWIO", "NHWC"),
        preferred_element_type=jnp.float32)


def _ref_bn(x, g, b):
    mean = jnp.mean(x, axis=(0, 1, 2), keepdims=True)
    var = jnp.mean((x - mean) ** 2, axis=(0, 1, 2), keepdims=True)
    return ((x - mean) * jax.lax.rsqrt(var + _BN_EPS)
            * g.reshape(1, 1, 1, -1) + b.reshape(1, 1, 1, -1))


def _ref_forward(x_nchw, params, stride):
    x = jnp.transpose(x_nchw, (0, 2, 3, 1)).astype(jnp.float32)
    pad3 = [(1, 1), (1, 1)]
    out = jax.nn.relu(_ref_bn(_ref_conv(x, params["w1"], stride, pad3),
                              params["g1"], params["b1"]))
    out = _ref_bn(_ref_conv(out, params["w2"], 1, pad3),
                  params["g2"], params["b2"])
    if "w_sc" in params:
        sc = _ref_bn(_ref_conv(x, params["w_sc"], stride, [(0, 0), (0, 0)]),
                     params["g_sc"], params["b_sc"])
    else:
        sc = x
    out = jax.nn.relu(out + sc)
    return jnp.transpose(out, (0, 3, 1, 2))


if __name__ == "__main__":
    def run_case(key, n, in_planes, planes, h, w, stride):
        kx, kp = jax.random.split(key)
        x = jax.random.normal(kx, (n, in_planes, h, w), jnp.float32)
        params = init_params(kp, in_planes, planes, stride)

        fwd = jax.jit(functools.partial(basic_block_forward, stride=stride))
        out = fwd(x, params)
        jax.block_until_ready(out)
        assert out.shape == (n, planes, h // stride, w // stride), out.shape

        ref = _ref_forward(x, params, stride)
        max_err = float(jnp.max(jnp.abs(out - ref)))
        assert max_err < 2e-2, f"mismatch vs JAX reference: {max_err}"

    root = jax.random.PRNGKey(0)
    k1, k2 = jax.random.split(root)
    # BasicBlock(4 -> 8, stride 1): exercises the 1x1-conv + BN projection shortcut.
    run_case(k1, 2, 4, 8, 16, 16, 1)
    # BasicBlock(8 -> 8, stride 1): exercises the identity shortcut.
    run_case(k2, 2, 8, 8, 16, 16, 1)

    print("KERNEL_OK")
</pallas_src>

<mosaic_0001>
module attributes {stable_mosaic.version = 11 : i64} {
  func.func @_conv_stats_kernel(%arg0: i32, %arg1: i32, %arg2: memref<256x36xbf16, #tpu.memory_space<vmem>>, %arg3: memref<36x128xbf16, #tpu.memory_space<vmem>>, %arg4: memref<256x128xf32, #tpu.memory_space<vmem>>, %arg5: memref<1x128xf32, #tpu.memory_space<vmem>>, %arg6: memref<1x128xf32, #tpu.memory_space<vmem>>) attributes {dimension_semantics = [#tpu.dimension_semantics<parallel>, #tpu.dimension_semantics<arbitrary>], iteration_bounds = array<i64: 1, 2>, scalar_prefetch = 0 : i64, scratch_operands = 0 : i64, tpu.core_type = #tpu.core_type<tc>, window_params = [{transform_indices = @transform_0, window_bounds = array<i64: 256, 36>}, {transform_indices = @transform_1, window_bounds = array<i64: 36, 128>}, {transform_indices = @transform_2, window_bounds = array<i64: 256, 128>}, {transform_indices = @transform_3, window_bounds = array<i64: 1, 128>}, {transform_indices = @transform_4, window_bounds = array<i64: 1, 128>}]} {
    %c0 = arith.constant 0 : index
    %c0_0 = arith.constant 0 : index
    %0 = vector.load %arg2[%c0, %c0_0] : memref<256x36xbf16, #tpu.memory_space<vmem>>, vector<256x36xbf16>
    %c0_1 = arith.constant 0 : index
    %c0_2 = arith.constant 0 : index
    %1 = vector.load %arg3[%c0_1, %c0_2] : memref<36x128xbf16, #tpu.memory_space<vmem>>, vector<36x128xbf16>
    %cst = arith.constant dense<0.000000e+00> : vector<256x128xf32>
    %2 = tpu.matmul %0, %1, %cst {dimension_numbers = #tpu.dot_dimension_numbers<[1], [0], [0], [1], [0, 0, 1, 1], [], []>} : vector<256x36xbf16>, vector<36x128xbf16>, vector<256x128xf32> -> vector<256x128xf32>
    %c0_3 = arith.constant 0 : index
    %c0_4 = arith.constant 0 : index
    %3 = vector.load %arg4[%c0_3, %c0_4] : memref<256x128xf32, #tpu.memory_space<vmem>>, vector<256x128xf32>
    tpu.vector_store %arg4[%c0_3, %c0_4], %2 {strides = array<i32>} : memref<256x128xf32, #tpu.memory_space<vmem>>, vector<256x128xf32>,
    %c0_i32 = arith.constant 0 : i32
    %4 = arith.cmpi eq, %arg1, %c0_i32 : i32
    %5 = arith.extui %4 : i1 to i32
    %c0_i32_5 = arith.constant 0 : i32
    %6 = arith.cmpi ne, %5, %c0_i32_5 : i32
    scf.if %6 {
      %cst_16 = arith.constant 0.000000e+00 : f32
      %18 = vector.broadcast %cst_16 : f32 to vector<1x128xf32>
      %c0_17 = arith.constant 0 : index
      %c0_18 = arith.constant 0 : index
      %19 = vector.load %arg5[%c0_17, %c0_18] : memref<1x128xf32, #tpu.memory_space<vmem>>, vector<1x128xf32>
      tpu.vector_store %arg5[%c0_17, %c0_18], %18 {strides = array<i32>} : memref<1x128xf32, #tpu.memory_space<vmem>>, vector<1x128xf32>,
      %cst_19 = arith.constant 0.000000e+00 : f32
      %20 = vector.broadcast %cst_19 : f32 to vector<1x128xf32>
      %c0_20 = arith.constant 0 : index
      %c0_21 = arith.constant 0 : index
      %21 = vector.load %arg6[%c0_20, %c0_21] : memref<1x128xf32, #tpu.memory_space<vmem>>, vector<1x128xf32>
      tpu.vector_store %arg6[%c0_20, %c0_21], %20 {strides = array<i32>} : memref<1x128xf32, #tpu.memory_space<vmem>>, vector<1x128xf32>,
    } else {
    }
    %c0_6 = arith.constant 0 : index
    %c0_7 = arith.constant 0 : index
    %7 = vector.load %arg5[%c0_6, %c0_7] : memref<1x128xf32, #tpu.memory_space<vmem>>, vector<1x128xf32>
    %cst_8 = arith.constant dense<0.000000e+00> : vector<128xf32>
    %8 = vector.multi_reduction <add>, %2, %cst_8 [0] : vector<256x128xf32> to vector<128xf32>
    %9 = vector.shape_cast %8 : vector<128xf32> to vector<1x128xf32>
    %10 = arith.addf %7, %9 : vector<1x128xf32>
    %c0_9 = arith.constant 0 : index
    %c0_10 = arith.constant 0 : index
    %11 = vector.load %arg5[%c0_9, %c0_10] : memref<1x128xf32, #tpu.memory_space<vmem>>, vector<1x128xf32>
    tpu.vector_store %arg5[%c0_9, %c0_10], %10 {strides = array<i32>} : memref<1x128xf32, #tpu.memory_space<vmem>>, vector<1x128xf32>,
    %c0_11 = arith.constant 0 : index
    %c0_12 = arith.constant 0 : index
    %12 = vector.load %arg6[%c0_11, %c0_12] : memref<1x128xf32, #tpu.memory_space<vmem>>, vector<1x128xf32>
    %13 = arith.mulf %2, %2 : vector<256x128xf32>
    %cst_13 = arith.constant dense<0.000000e+00> : vector<128xf32>
    %14 = vector.multi_reduction <add>, %13, %cst_13 [0] : vector<256x128xf32> to vector<128xf32>
    %15 = vector.shape_cast %14 : vector<128xf32> to vector<1x128xf32>
    %16 = arith.addf %12, %15 : vector<1x128xf32>
    %c0_14 = arith.constant 0 : index
    %c0_15 = arith.constant 0 : index
    %17 = vector.load %arg6[%c0_14, %c0_15] : memref<1x128xf32, #tpu.memory_space<vmem>>, vector<1x128xf32>
    tpu.vector_store %arg6[%c0_14, %c0_15], %16 {strides = array<i32>} : memref<1x128xf32, #tpu.memory_space<vmem>>, vector<1x128xf32>,
    return
  }
  func.func @transform_0(%arg0: i32, %arg1: i32) -> (i32, i32) {
    %c0_i32 = arith.constant 0 : i32
    %c0_i32_0 = arith.constant 0 : i32
    return %arg1, %c0_i32 : i32, i32
  }
  func.func @transform_1(%arg0: i32, %arg1: i32) -> (i32, i32) {
    %c0_i32 = arith.constant 0 : i32
    %c0_i32_0 = arith.constant 0 : i32
    return %c0_i32, %arg0 : i32, i32
  }
  func.func @transform_2(%arg0: i32, %arg1: i32) -> (i32, i32) {
    %c0_i32 = arith.constant 0 : i32
    return %arg1, %arg0 : i32, i32
  }
  func.func @transform_3(%arg0: i32, %arg1: i32) -> (i32, i32) {
    %c0_i32 = arith.constant 0 : i32
    %c0_i32_0 = arith.constant 0 : i32
    return %c0_i32, %arg0 : i32, i32
  }
  func.func @transform_4(%arg0: i32, %arg1: i32) -> (i32, i32) {
    %c0_i32 = arith.constant 0 : i32
    %c0_i32_0 = arith.constant 0 : i32
    return %c0_i32, %arg0 : i32, i32
  }
}

module attributes {stable_mosaic.version = 11 : i64} {
  func.func @kernel(%arg0: i32, %arg1: i32, %arg2: memref<256x128xf32, #tpu.memory_space<vmem>>, %arg3: memref<1x128xf32, #tpu.memory_space<vmem>>, %arg4: memref<1x128xf32, #tpu.memory_space<vmem>>, %arg5: memref<1x128xf32, #tpu.memory_space<vmem>>, %arg6: memref<1x128xf32, #tpu.memory_space<vmem>>, %arg7: memref<256x128xf32, #tpu.memory_space<vmem>>) attributes {dimension_semantics = [#tpu.dimension_semantics<parallel>, #tpu.dimension_semantics<parallel>], iteration_bounds = array<i64: 1, 2>, scalar_prefetch = 0 : i64, scratch_operands = 0 : i64, tpu.core_type = #tpu.core_type<tc>, window_params = [{transform_indices = @transform_0, window_bounds = array<i64: 256, 128>}, {transform_indices = @transform_1, window_bounds = array<i64: 1, 128>}, {transform_indices = @transform_2, window_bounds = array<i64: 1, 128>}, {transform_indices = @transform_3, window_bounds = array<i64: 1, 128>}, {transform_indices = @transform_4, window_bounds = array<i64: 1, 128>}, {transform_indices = @transform_5, window_bounds = array<i64: 256, 128>}]} {
    %c0 = arith.constant 0 : index
    %c0_0 = arith.constant 0 : index
    %0 = vector.load %arg2[%c0, %c0_0] : memref<256x128xf32, #tpu.memory_space<vmem>>, vector<256x128xf32>
    %c0_1 = arith.constant 0 : index
    %c0_2 = arith.constant 0 : index
    %1 = vector.load %arg3[%c0_1, %c0_2] : memref<1x128xf32, #tpu.memory_space<vmem>>, vector<1x128xf32>
    %cst = arith.constant 0.001953125 : f32
    %2 = vector.broadcast %cst : f32 to vector<1x128xf32>
    %3 = arith.mulf %1, %2 : vector<1x128xf32>
    %c0_3 = arith.constant 0 : index
    %c0_4 = arith.constant 0 : index
    %4 = vector.load %arg4[%c0_3, %c0_4] : memref<1x128xf32, #tpu.memory_space<vmem>>, vector<1x128xf32>
    %cst_5 = arith.constant 0.001953125 : f32
    %5 = vector.broadcast %cst_5 : f32 to vector<1x128xf32>
    %6 = arith.mulf %4, %5 : vector<1x128xf32>
    %7 = arith.mulf %3, %3 : vector<1x128xf32>
    %8 = arith.subf %6, %7 : vector<1x128xf32>
    %c0_6 = arith.constant 0 : index
    %c0_7 = arith.constant 0 : index
    %9 = vector.load %arg5[%c0_6, %c0_7] : memref<1x128xf32, #tpu.memory_space<vmem>>, vector<1x128xf32>
    %cst_8 = arith.constant 9.99999974E-6 : f32
    %10 = vector.broadcast %cst_8 : f32 to vector<1x128xf32>
    %11 = arith.addf %8, %10 : vector<1x128xf32>
    %12 = math.rsqrt %11 : vector<1x128xf32>
    %13 = arith.mulf %9, %12 : vector<1x128xf32>
    %14 = vector.broadcast %3 : vector<1x128xf32> to vector<256x128xf32>
    %15 = arith.subf %0, %14 : vector<256x128xf32>
    %16 = vector.broadcast %13 : vector<1x128xf32> to vector<256x128xf32>
    %17 = arith.mulf %15, %16 : vector<256x128xf32>
    %c0_9 = arith.constant 0 : index
    %c0_10 = arith.constant 0 : index
    %18 = vector.load %arg6[%c0_9, %c0_10] : memref<1x128xf32, #tpu.memory_space<vmem>>, vector<1x128xf32>
    %19 = vector.broadcast %18 : vector<1x128xf32> to vector<256x128xf32>
    %20 = arith.addf %17, %19 : vector<256x128xf32>
    %cst_11 = arith.constant 0.000000e+00 : f32
    %21 = vector.broadcast %cst_11 : f32 to vector<256x128xf32>
    %22 = arith.maximumf %20, %21 : vector<256x128xf32>
    %c0_12 = arith.constant 0 : index
    %c0_13 = arith.constant 0 : index
    %23 = vector.load %arg7[%c0_12, %c0_13] : memref<256x128xf32, #tpu.memory_space<vmem>>, vector<256x128xf32>
    tpu.vector_store %arg7[%c0_12, %c0_13], %22 {strides = array<i32>} : memref<256x128xf32, #tpu.memory_space<vmem>>, vector<256x128xf32>,
    return
  }
  func.func @transform_0(%arg0: i32, %arg1: i32) -> (i32, i32) {
    %c0_i32 = arith.constant 0 : i32
    return %arg1, %arg0 : i32, i32
  }
  func.func @transform_1(%arg0: i32, %arg1: i32) -> (i32, i32) {
    %c0_i32 = arith.constant 0 : i32
    %c0_i32_0 = arith.constant 0 : i32
    return %c0_i32, %arg0 : i32, i32
  }
  func.func @transform_2(%arg0: i32, %arg1: i32) -> (i32, i32) {
    %c0_i32 = arith.constant 0 : i32
    %c0_i32_0 = arith.constant 0 : i32
    return %c0_i32, %arg0 : i32, i32
  }
  func.func @transform_3(%arg0: i32, %arg1: i32) -> (i32, i32) {
    %c0_i32 = arith.constant 0 : i32
    %c0_i32_0 = arith.constant 0 : i32
    return %c0_i32, %arg0 : i32, i32
  }
  func.func @transform_4(%arg0: i32, %arg1: i32) -> (i32, i32) {
    %c0_i32 = arith.constant 0 : i32
    %c0_i32_0 = arith.constant 0 : i32
    return %c0_i32, %arg0 : i32, i32
  }
  func.func @transform_5(%arg0: i32, %arg1: i32) -> (i32, i32) {
    %c0_i32 = arith.constant 0 : i32
    return %arg1, %arg0 : i32, i32
  }
}

module attributes {stable_mosaic.version = 11 : i64} {
  func.func @_conv_stats_kernel(%arg0: i32, %arg1: i32, %arg2: memref<256x72xbf16, #tpu.memory_space<vmem>>, %arg3: memref<72x128xbf16, #tpu.memory_space<vmem>>, %arg4: memref<256x128xf32, #tpu.memory_space<vmem>>, %arg5: memref<1x128xf32, #tpu.memory_space<vmem>>, %arg6: memref<1x128xf32, #tpu.memory_space<vmem>>) attributes {dimension_semantics = [#tpu.dimension_semantics<parallel>, #tpu.dimension_semantics<arbitrary>], iteration_bounds = array<i64: 1, 2>, scalar_prefetch = 0 : i64, scratch_operands = 0 : i64, tpu.core_type = #tpu.core_type<tc>, window_params = [{transform_indices = @transform_0, window_bounds = array<i64: 256, 72>}, {transform_indices = @transform_1, window_bounds = array<i64: 72, 128>}, {transform_indices = @transform_2, window_bounds = array<i64: 256, 128>}, {transform_indices = @transform_3, window_bounds = array<i64: 1, 128>}, {transform_indices = @transform_4, window_bounds = array<i64: 1, 128>}]} {
    %c0 = arith.constant 0 : index
    %c0_0 = arith.constant 0 : index
    %0 = vector.load %arg2[%c0, %c0_0] : memref<256x72xbf16, #tpu.memory_space<vmem>>, vector<256x72xbf16>
    %c0_1 = arith.constant 0 : index
    %c0_2 = arith.constant 0 : index
    %1 = vector.load %arg3[%c0_1, %c0_2] : memref<72x128xbf16, #tpu.memory_space<vmem>>, vector<72x128xbf16>
    %cst = arith.constant dense<0.000000e+00> : vector<256x128xf32>
    %2 = tpu.matmul %0, %1, %cst {dimension_numbers = #tpu.dot_dimension_numbers<[1], [0], [0], [1], [0, 0, 1, 1], [], []>} : vector<256x72xbf16>, vector<72x128xbf16>, vector<256x128xf32> -> vector<256x128xf32>
    %c0_3 = arith.constant 0 : index
    %c0_4 = arith.constant 0 : index
    %3 = vector.load %arg4[%c0_3, %c0_4] : memref<256x128xf32, #tpu.memory_space<vmem>>, vector<256x128xf32>
    tpu.vector_store %arg4[%c0_3, %c0_4], %2 {strides = array<i32>} : memref<256x128xf32, #tpu.memory_space<vmem>>, vector<256x128xf32>,
    %c0_i32 = arith.constant 0 : i32
    %4 = arith.cmpi eq, %arg1, %c0_i32 : i32
    %5 = arith.extui %4 : i1 to i32
    %c0_i32_5 = arith.constant 0 : i32
    %6 = arith.cmpi ne, %5, %c0_i32_5 : i32
    scf.if %6 {
      %cst_16 = arith.constant 0.000000e+00 : f32
      %18 = vector.broadcast %cst_16 : f32 to vector<1x128xf32>
      %c0_17 = arith.constant 0 : index
      %c0_18 = arith.constant 0 : index
      %19 = vector.load %arg5[%c0_17, %c0_18] : memref<1x128xf32, #tpu.memory_space<vmem>>, vector<1x128xf32>
      tpu.vector_store %arg5[%c0_17, %c0_18], %18 {strides = array<i32>} : memref<1x128xf32, #tpu.memory_space<vmem>>, vector<1x128xf32>,
      %cst_19 = arith.constant 0.000000e+00 : f32
      %20 = vector.broadcast %cst_19 : f32 to vector<1x128xf32>
      %c0_20 = arith.constant 0 : index
      %c0_21 = arith.constant 0 : index
      %21 = vector.load %arg6[%c0_20, %c0_21] : memref<1x128xf32, #tpu.memory_space<vmem>>, vector<1x128xf32>
      tpu.vector_store %arg6[%c0_20, %c0_21], %20 {strides = array<i32>} : memref<1x128xf32, #tpu.memory_space<vmem>>, vector<1x128xf32>,
    } else {
    }
    %c0_6 = arith.constant 0 : index
    %c0_7 = arith.constant 0 : index
    %7 = vector.load %arg5[%c0_6, %c0_7] : memref<1x128xf32, #tpu.memory_space<vmem>>, vector<1x128xf32>
    %cst_8 = arith.constant dense<0.000000e+00> : vector<128xf32>
    %8 = vector.multi_reduction <add>, %2, %cst_8 [0] : vector<256x128xf32> to vector<128xf32>
    %9 = vector.shape_cast %8 : vector<128xf32> to vector<1x128xf32>
    %10 = arith.addf %7, %9 : vector<1x128xf32>
    %c0_9 = arith.constant 0 : index
    %c0_10 = arith.constant 0 : index
    %11 = vector.load %arg5[%c0_9, %c0_10] : memref<1x128xf32, #tpu.memory_space<vmem>>, vector<1x128xf32>
    tpu.vector_store %arg5[%c0_9, %c0_10], %10 {strides = array<i32>} : memref<1x128xf32, #tpu.memory_space<vmem>>, vector<1x128xf32>,
    %c0_11 = arith.constant 0 : index
    %c0_12 = arith.constant 0 : index
    %12 = vector.load %arg6[%c0_11, %c0_12] : memref<1x128xf32, #tpu.memory_space<vmem>>, vector<1x128xf32>
    %13 = arith.mulf %2, %2 : vector<256x128xf32>
    %cst_13 = arith.constant dense<0.000000e+00> : vector<128xf32>
    %14 = vector.multi_reduction <add>, %13, %cst_13 [0] : vector<256x128xf32> to vector<128xf32>
    %15 = vector.shape_cast %14 : vector<128xf32> to vector<1x128xf32>
    %16 = arith.addf %12, %15 : vector<1x128xf32>
    %c0_14 = arith.constant 0 : index
    %c0_15 = arith.constant 0 : index
    %17 = vector.load %arg6[%c0_14, %c0_15] : memref<1x128xf32, #tpu.memory_space<vmem>>, vector<1x128xf32>
    tpu.vector_store %arg6[%c0_14, %c0_15], %16 {strides = array<i32>} : memref<1x128xf32, #tpu.memory_space<vmem>>, vector<1x128xf32>,
    return
  }
  func.func @transform_0(%arg0: i32, %arg1: i32) -> (i32, i32) {
    %c0_i32 = arith.constant 0 : i32
    %c0_i32_0 = arith.constant 0 : i32
    return %arg1, %c0_i32 : i32, i32
  }
  func.func @transform_1(%arg0: i32, %arg1: i32) -> (i32, i32) {
    %c0_i32 = arith.constant 0 : i32
    %c0_i32_0 = arith.constant 0 : i32
    return %c0_i32, %arg0 : i32, i32
  }
  func.func @transform_2(%arg0: i32, %arg1: i32) -> (i32, i32) {
    %c0_i32 = arith.constant 0 : i32
    return %arg1, %arg0 : i32, i32
  }
  func.func @transform_3(%arg0: i32, %arg1: i32) -> (i32, i32) {
    %c0_i32 = arith.constant 0 : i32
    %c0_i32_0 = arith.constant 0 : i32
    return %c0_i32, %arg0 : i32, i32
  }
  func.func @transform_4(%arg0: i32, %arg1: i32) -> (i32, i32) {
    %c0_i32 = arith.constant 0 : i32
    %c0_i32_0 = arith.constant 0 : i32
    return %c0_i32, %arg0 : i32, i32
  }
}

module attributes {stable_mosaic.version = 11 : i64} {
  func.func @_conv_stats_kernel(%arg0: i32, %arg1: i32, %arg2: memref<256x4xbf16, #tpu.memory_space<vmem>>, %arg3: memref<4x128xbf16, #tpu.memory_space<vmem>>, %arg4: memref<256x128xf32, #tpu.memory_space<vmem>>, %arg5: memref<1x128xf32, #tpu.memory_space<vmem>>, %arg6: memref<1x128xf32, #tpu.memory_space<vmem>>) attributes {dimension_semantics = [#tpu.dimension_semantics<parallel>, #tpu.dimension_semantics<arbitrary>], iteration_bounds = array<i64: 1, 2>, scalar_prefetch = 0 : i64, scratch_operands = 0 : i64, tpu.core_type = #tpu.core_type<tc>, window_params = [{transform_indices = @transform_0, window_bounds = array<i64: 256, 4>}, {transform_indices = @transform_1, window_bounds = array<i64: 4, 128>}, {transform_indices = @transform_2, window_bounds = array<i64: 256, 128>}, {transform_indices = @transform_3, window_bounds = array<i64: 1, 128>}, {transform_indices = @transform_4, window_bounds = array<i64: 1, 128>}]} {
    %c0 = arith.constant 0 : index
    %c0_0 = arith.constant 0 : index
    %0 = vector.load %arg2[%c0, %c0_0] : memref<256x4xbf16, #tpu.memory_space<vmem>>, vector<256x4xbf16>
    %c0_1 = arith.constant 0 : index
    %c0_2 = arith.constant 0 : index
    %1 = vector.load %arg3[%c0_1, %c0_2] : memref<4x128xbf16, #tpu.memory_space<vmem>>, vector<4x128xbf16>
    %cst = arith.constant dense<0.000000e+00> : vector<256x128xf32>
    %2 = tpu.matmul %0, %1, %cst {dimension_numbers = #tpu.dot_dimension_numbers<[1], [0], [0], [1], [0, 0, 1, 1], [], []>} : vector<256x4xbf16>, vector<4x128xbf16>, vector<256x128xf32> -> vector<256x128xf32>
    %c0_3 = arith.constant 0 : index
    %c0_4 = arith.constant 0 : index
    %3 = vector.load %arg4[%c0_3, %c0_4] : memref<256x128xf32, #tpu.memory_space<vmem>>, vector<256x128xf32>
    tpu.vector_store %arg4[%c0_3, %c0_4], %2 {strides = array<i32>} : memref<256x128xf32, #tpu.memory_space<vmem>>, vector<256x128xf32>,
    %c0_i32 = arith.constant 0 : i32
    %4 = arith.cmpi eq, %arg1, %c0_i32 : i32
    %5 = arith.extui %4 : i1 to i32
    %c0_i32_5 = arith.constant 0 : i32
    %6 = arith.cmpi ne, %5, %c0_i32_5 : i32
    scf.if %6 {
      %cst_16 = arith.constant 0.000000e+00 : f32
      %18 = vector.broadcast %cst_16 : f32 to vector<1x128xf32>
      %c0_17 = arith.constant 0 : index
      %c0_18 = arith.constant 0 : index
      %19 = vector.load %arg5[%c0_17, %c0_18] : memref<1x128xf32, #tpu.memory_space<vmem>>, vector<1x128xf32>
      tpu.vector_store %arg5[%c0_17, %c0_18], %18 {strides = array<i32>} : memref<1x128xf32, #tpu.memory_space<vmem>>, vector<1x128xf32>,
      %cst_19 = arith.constant 0.000000e+00 : f32
      %20 = vector.broadcast %cst_19 : f32 to vector<1x128xf32>
      %c0_20 = arith.constant 0 : index
      %c0_21 = arith.constant 0 : index
      %21 = vector.load %arg6[%c0_20, %c0_21] : memref<1x128xf32, #tpu.memory_space<vmem>>, vector<1x128xf32>
      tpu.vector_store %arg6[%c0_20, %c0_21], %20 {strides = array<i32>} : memref<1x128xf32, #tpu.memory_space<vmem>>, vector<1x128xf32>,
    } else {
    }
    %c0_6 = arith.constant 0 : index
    %c0_7 = arith.constant 0 : index
    %7 = vector.load %arg5[%c0_6, %c0_7] : memref<1x128xf32, #tpu.memory_space<vmem>>, vector<1x128xf32>
    %cst_8 = arith.constant dense<0.000000e+00> : vector<128xf32>
    %8 = vector.multi_reduction <add>, %2, %cst_8 [0] : vector<256x128xf32> to vector<128xf32>
    %9 = vector.shape_cast %8 : vector<128xf32> to vector<1x128xf32>
    %10 = arith.addf %7, %9 : vector<1x128xf32>
    %c0_9 = arith.constant 0 : index
    %c0_10 = arith.constant 0 : index
    %11 = vector.load %arg5[%c0_9, %c0_10] : memref<1x128xf32, #tpu.memory_space<vmem>>, vector<1x128xf32>
    tpu.vector_store %arg5[%c0_9, %c0_10], %10 {strides = array<i32>} : memref<1x128xf32, #tpu.memory_space<vmem>>, vector<1x128xf32>,
    %c0_11 = arith.constant 0 : index
    %c0_12 = arith.constant 0 : index
    %12 = vector.load %arg6[%c0_11, %c0_12] : memref<1x128xf32, #tpu.memory_space<vmem>>, vector<1x128xf32>
    %13 = arith.mulf %2, %2 : vector<256x128xf32>
    %cst_13 = arith.constant dense<0.000000e+00> : vector<128xf32>
    %14 = vector.multi_reduction <add>, %13, %cst_13 [0] : vector<256x128xf32> to vector<128xf32>
    %15 = vector.shape_cast %14 : vector<128xf32> to vector<1x128xf32>
    %16 = arith.addf %12, %15 : vector<1x128xf32>
    %c0_14 = arith.constant 0 : index
    %c0_15 = arith.constant 0 : index
    %17 = vector.load %arg6[%c0_14, %c0_15] : memref<1x128xf32, #tpu.memory_space<vmem>>, vector<1x128xf32>
    tpu.vector_store %arg6[%c0_14, %c0_15], %16 {strides = array<i32>} : memref<1x128xf32, #tpu.memory_space<vmem>>, vector<1x128xf32>,
    return
  }
  func.func @transform_0(%arg0: i32, %arg1: i32) -> (i32, i32) {
    %c0_i32 = arith.constant 0 : i32
    %c0_i32_0 = arith.constant 0 : i32
    return %arg1, %c0_i32 : i32, i32
  }
  func.func @transform_1(%arg0: i32, %arg1: i32) -> (i32, i32) {
    %c0_i32 = arith.constant 0 : i32
    %c0_i32_0 = arith.constant 0 : i32
    return %c0_i32, %arg0 : i32, i32
  }
  func.func @transform_2(%arg0: i32, %arg1: i32) -> (i32, i32) {
    %c0_i32 = arith.constant 0 : i32
    return %arg1, %arg0 : i32, i32
  }
  func.func @transform_3(%arg0: i32, %arg1: i32) -> (i32, i32) {
    %c0_i32 = arith.constant 0 : i32
    %c0_i32_0 = arith.constant 0 : i32
    return %c0_i32, %arg0 : i32, i32
  }
  func.func @transform_4(%arg0: i32, %arg1: i32) -> (i32, i32) {
    %c0_i32 = arith.constant 0 : i32
    %c0_i32_0 = arith.constant 0 : i32
    return %c0_i32, %arg0 : i32, i32
  }
}

module attributes {stable_mosaic.version = 11 : i64} {
  func.func @kernel(%arg0: i32, %arg1: i32, %arg2: memref<256x128xf32, #tpu.memory_space<vmem>>, %arg3: memref<1x128xf32, #tpu.memory_space<vmem>>, %arg4: memref<1x128xf32, #tpu.memory_space<vmem>>, %arg5: memref<1x128xf32, #tpu.memory_space<vmem>>, %arg6: memref<1x128xf32, #tpu.memory_space<vmem>>, %arg7: memref<256x128xf32, #tpu.memory_space<vmem>>) attributes {dimension_semantics = [#tpu.dimension_semantics<parallel>, #tpu.dimension_semantics<parallel>], iteration_bounds = array<i64: 1, 2>, scalar_prefetch = 0 : i64, scratch_operands = 0 : i64, tpu.core_type = #tpu.core_type<tc>, window_params = [{transform_indices = @transform_0, window_bounds = array<i64: 256, 128>}, {transform_indices = @transform_1, window_bounds = array<i64: 1, 128>}, {transform_indices = @transform_2, window_bounds = array<i64: 1, 128>}, {transform_indices = @transform_3, window_bounds = array<i64: 1, 128>}, {transform_indices = @transform_4, window_bounds = array<i64: 1, 128>}, {transform_indices = @transform_5, window_bounds = array<i64: 256, 128>}]} {
    %c0 = arith.constant 0 : index
    %c0_0 = arith.constant 0 : index
    %0 = vector.load %arg2[%c0, %c0_0] : memref<256x128xf32, #tpu.memory_space<vmem>>, vector<256x128xf32>
    %c0_1 = arith.constant 0 : index
    %c0_2 = arith.constant 0 : index
    %1 = vector.load %arg3[%c0_1, %c0_2] : memref<1x128xf32, #tpu.memory_space<vmem>>, vector<1x128xf32>
    %cst = arith.constant 0.001953125 : f32
    %2 = vector.broadcast %cst : f32 to vector<1x128xf32>
    %3 = arith.mulf %1, %2 : vector<1x128xf32>
    %c0_3 = arith.constant 0 : index
    %c0_4 = arith.constant 0 : index
    %4 = vector.load %arg4[%c0_3, %c0_4] : memref<1x128xf32, #tpu.memory_space<vmem>>, vector<1x128xf32>
    %cst_5 = arith.constant 0.001953125 : f32
    %5 = vector.broadcast %cst_5 : f32 to vector<1x128xf32>
    %6 = arith.mulf %4, %5 : vector<1x128xf32>
    %7 = arith.mulf %3, %3 : vector<1x128xf32>
    %8 = arith.subf %6, %7 : vector<1x128xf32>
    %c0_6 = arith.constant 0 : index
    %c0_7 = arith.constant 0 : index
    %9 = vector.load %arg5[%c0_6, %c0_7] : memref<1x128xf32, #tpu.memory_space<vmem>>, vector<1x128xf32>
    %cst_8 = arith.constant 9.99999974E-6 : f32
    %10 = vector.broadcast %cst_8 : f32 to vector<1x128xf32>
    %11 = arith.addf %8, %10 : vector<1x128xf32>
    %12 = math.rsqrt %11 : vector<1x128xf32>
    %13 = arith.mulf %9, %12 : vector<1x128xf32>
    %14 = vector.broadcast %3 : vector<1x128xf32> to vector<256x128xf32>
    %15 = arith.subf %0, %14 : vector<256x128xf32>
    %16 = vector.broadcast %13 : vector<1x128xf32> to vector<256x128xf32>
    %17 = arith.mulf %15, %16 : vector<256x128xf32>
    %c0_9 = arith.constant 0 : index
    %c0_10 = arith.constant 0 : index
    %18 = vector.load %arg6[%c0_9, %c0_10] : memref<1x128xf32, #tpu.memory_space<vmem>>, vector<1x128xf32>
    %19 = vector.broadcast %18 : vector<1x128xf32> to vector<256x128xf32>
    %20 = arith.addf %17, %19 : vector<256x128xf32>
    %c0_11 = arith.constant 0 : index
    %c0_12 = arith.constant 0 : index
    %21 = vector.load %arg7[%c0_11, %c0_12] : memref<256x128xf32, #tpu.memory_space<vmem>>, vector<256x128xf32>
    tpu.vector_store %arg7[%c0_11, %c0_12], %20 {strides = array<i32>} : memref<256x128xf32, #tpu.memory_space<vmem>>, vector<256x128xf32>,
    return
  }
  func.func @transform_0(%arg0: i32, %arg1: i32) -> (i32, i32) {
    %c0_i32 = arith.constant 0 : i32
    return %arg1, %arg0 : i32, i32
  }
  func.func @transform_1(%arg0: i32, %arg1: i32) -> (i32, i32) {
    %c0_i32 = arith.constant 0 : i32
    %c0_i32_0 = arith.constant 0 : i32
    return %c0_i32, %arg0 : i32, i32
  }
  func.func @transform_2(%arg0: i32, %arg1: i32) -> (i32, i32) {
    %c0_i32 = arith.constant 0 : i32
    %c0_i32_0 = arith.constant 0 : i32
    return %c0_i32, %arg0 : i32, i32
  }
  func.func @transform_3(%arg0: i32, %arg1: i32) -> (i32, i32) {
    %c0_i32 = arith.constant 0 : i32
    %c0_i32_0 = arith.constant 0 : i32
    return %c0_i32, %arg0 : i32, i32
  }
  func.func @transform_4(%arg0: i32, %arg1: i32) -> (i32, i32) {
    %c0_i32 = arith.constant 0 : i32
    %c0_i32_0 = arith.constant 0 : i32
    return %c0_i32, %arg0 : i32, i32
  }
  func.func @transform_5(%arg0: i32, %arg1: i32) -> (i32, i32) {
    %c0_i32 = arith.constant 0 : i32
    return %arg1, %arg0 : i32, i32
  }
}

module attributes {stable_mosaic.version = 11 : i64} {
  func.func @kernel(%arg0: i32, %arg1: i32, %arg2: memref<256x128xf32, #tpu.memory_space<vmem>>, %arg3: memref<1x128xf32, #tpu.memory_space<vmem>>, %arg4: memref<1x128xf32, #tpu.memory_space<vmem>>, %arg5: memref<1x128xf32, #tpu.memory_space<vmem>>, %arg6: memref<1x128xf32, #tpu.memory_space<vmem>>, %arg7: memref<256x128xf32, #tpu.memory_space<vmem>>, %arg8: memref<256x128xf32, #tpu.memory_space<vmem>>) attributes {dimension_semantics = [#tpu.dimension_semantics<parallel>, #tpu.dimension_semantics<parallel>], iteration_bounds = array<i64: 1, 2>, scalar_prefetch = 0 : i64, scratch_operands = 0 : i64, tpu.core_type = #tpu.core_type<tc>, window_params = [{transform_indices = @transform_0, window_bounds = array<i64: 256, 128>}, {transform_indices = @transform_1, window_bounds = array<i64: 1, 128>}, {transform_indices = @transform_2, window_bounds = array<i64: 1, 128>}, {transform_indices = @transform_3, window_bounds = array<i64: 1, 128>}, {transform_indices = @transform_4, window_bounds = array<i64: 1, 128>}, {transform_indices = @transform_5, window_bounds = array<i64: 256, 128>}, {transform_indices = @transform_6, window_bounds = array<i64: 256, 128>}]} {
    %c0 = arith.constant 0 : index
    %c0_0 = arith.constant 0 : index
    %0 = vector.load %arg2[%c0, %c0_0] : memref<256x128xf32, #tpu.memory_space<vmem>>, vector<256x128xf32>
    %c0_1 = arith.constant 0 : index
    %c0_2 = arith.constant 0 : index
    %1 = vector.load %arg3[%c0_1, %c0_2] : memref<1x128xf32, #tpu.memory_space<vmem>>, vector<1x128xf32>
    %cst = arith.constant 0.001953125 : f32
    %2 = vector.broadcast %cst : f32 to vector<1x128xf32>
    %3 = arith.mulf %1, %2 : vector<1x128xf32>
    %c0_3 = arith.constant 0 : index
    %c0_4 = arith.constant 0 : index
    %4 = vector.load %arg4[%c0_3, %c0_4] : memref<1x128xf32, #tpu.memory_space<vmem>>, vector<1x128xf32>
    %cst_5 = arith.constant 0.001953125 : f32
    %5 = vector.broadcast %cst_5 : f32 to vector<1x128xf32>
    %6 = arith.mulf %4, %5 : vector<1x128xf32>
    %7 = arith.mulf %3, %3 : vector<1x128xf32>
    %8 = arith.subf %6, %7 : vector<1x128xf32>
    %c0_6 = arith.constant 0 : index
    %c0_7 = arith.constant 0 : index
    %9 = vector.load %arg5[%c0_6, %c0_7] : memref<1x128xf32, #tpu.memory_space<vmem>>, vector<1x128xf32>
    %cst_8 = arith.constant 9.99999974E-6 : f32
    %10 = vector.broadcast %cst_8 : f32 to vector<1x128xf32>
    %11 = arith.addf %8, %10 : vector<1x128xf32>
    %12 = math.rsqrt %11 : vector<1x128xf32>
    %13 = arith.mulf %9, %12 : vector<1x128xf32>
    %14 = vector.broadcast %3 : vector<1x128xf32> to vector<256x128xf32>
    %15 = arith.subf %0, %14 : vector<256x128xf32>
    %16 = vector.broadcast %13 : vector<1x128xf32> to vector<256x128xf32>
    %17 = arith.mulf %15, %16 : vector<256x128xf32>
    %c0_9 = arith.constant 0 : index
    %c0_10 = arith.constant 0 : index
    %18 = vector.load %arg6[%c0_9, %c0_10] : memref<1x128xf32, #tpu.memory_space<vmem>>, vector<1x128xf32>
    %19 = vector.broadcast %18 : vector<1x128xf32> to vector<256x128xf32>
    %20 = arith.addf %17, %19 : vector<256x128xf32>
    %c0_11 = arith.constant 0 : index
    %c0_12 = arith.constant 0 : index
    %21 = vector.load %arg7[%c0_11, %c0_12] : memref<256x128xf32, #tpu.memory_space<vmem>>, vector<256x128xf32>
    %22 = arith.addf %20, %21 : vector<256x128xf32>
    %cst_13 = arith.constant 0.000000e+00 : f32
    %23 = vector.broadcast %cst_13 : f32 to vector<256x128xf32>
    %24 = arith.maximumf %22, %23 : vector<256x128xf32>
    %c0_14 = arith.constant 0 : index
    %c0_15 = arith.constant 0 : index
    %25 = vector.load %arg8[%c0_14, %c0_15] : memref<256x128xf32, #tpu.memory_space<vmem>>, vector<256x128xf32>
    tpu.vector_store %arg8[%c0_14, %c0_15], %24 {strides = array<i32>} : memref<256x128xf32, #tpu.memory_space<vmem>>, vector<256x128xf32>,
    return
  }
  func.func @transform_0(%arg0: i32, %arg1: i32) -> (i32, i32) {
    %c0_i32 = arith.constant 0 : i32
    return %arg1, %arg0 : i32, i32
  }
  func.func @transform_1(%arg0: i32, %arg1: i32) -> (i32, i32) {
    %c0_i32 = arith.constant 0 : i32
    %c0_i32_0 = arith.constant 0 : i32
    return %c0_i32, %arg0 : i32, i32
  }
  func.func @transform_2(%arg0: i32, %arg1: i32) -> (i32, i32) {
    %c0_i32 = arith.constant 0 : i32
    %c0_i32_0 = arith.constant 0 : i32
    return %c0_i32, %arg0 : i32, i32
  }
  func.func @transform_3(%arg0: i32, %arg1: i32) -> (i32, i32) {
    %c0_i32 = arith.constant 0 : i32
    %c0_i32_0 = arith.constant 0 : i32
    return %c0_i32, %arg0 : i32, i32
  }
  func.func @transform_4(%arg0: i32, %arg1: i32) -> (i32, i32) {
    %c0_i32 = arith.constant 0 : i32
    %c0_i32_0 = arith.constant 0 : i32
    return %c0_i32, %arg0 : i32, i32
  }
  func.func @transform_5(%arg0: i32, %arg1: i32) -> (i32, i32) {
    %c0_i32 = arith.constant 0 : i32
    return %arg1, %arg0 : i32, i32
  }
  func.func @transform_6(%arg0: i32, %arg1: i32) -> (i32, i32) {
    %c0_i32 = arith.constant 0 : i32
    return %arg1, %arg0 : i32, i32
  }
}

</mosaic_0001>

<bundles_post_ra>
// kernel: basic_block_forward.7
= control target key start
LH: loop header
LB: loop body
LE: loop exit
PB: predicated region body
PF: predicated region fallthrough
CT: control target
= control target key end

     0   :  { %s758_s18 = smov 0   ;;  %s760_s19 = smov 0   ;;  %s1151_s0 = inlined_call_operand.vmem [shape: f32[512,128], index: 0, kind: input, shape index: {}]   ;;  %s1152_s1 = inlined_call_operand.vmem [shape: f32[1,128], index: 1, kind: input, shape index: {}]   ;;  %s1153_s2 = inlined_call_operand.vmem [shape: f32[1,128], index: 2, kind: input, shape index: {}]   ;;  %s1154_s3 = inlined_call_operand.vmem [shape: f32[1,128], index: 3, kind: input, shape index: {}]   ;;  %s1155_s4 = inlined_call_operand.vmem [shape: f32[1,128], index: 4, kind: input, shape index: {}]   ;;  %s1156_s5 = inlined_call_operand.vmem [shape: f32[512,128], index: 5, kind: output, shape index: {}]  }
   0x1   :  { %s762_s20 = smov 0  }
   0x2 LB: > { %s24_s21 = sadd.s32 1, %s722_s19  ;;  %p670_p0 = scmp.ge.s32.totalorder %s726_s20, 1  ;;  %s726_s20 = sphi %s762_s20, %s15_s20   ;;  %s722_s19 = sphi %s760_s19, %s1165_s19   ;;  %s718_s18 = sphi %s758_s18, %s1164_s18  }
   0x3   : > { %p25_p1 = scmp.ge.s32.totalorder %s24_s21, 2  ;;  %p239_p2 = scmp.lt.s32.totalorder %s726_s20, 3 }
   0x5   : > { %s1167_s21 = smov (%p25_p1, %s24_s21), 0  ;;  %p240_p3 = pnand %p670_p0, %p239_p2 }
   0x6   : > { %s671_s22 = sshll.u32 (!%p240_p3), %s718_s18, 5 }
   0x7   : > { %243 = sbr.rel (%p240_p3) target bundleno = 71 (0x47), region = 40  ;;  %p286_p4 = scmp.lt.s32.totalorder (!%p240_p3), %s671_s22, 63 }
   0xc   : > { %v347_v0 = vld [vmem:[%s1152_s1] sm:$0x1]  ;;  %v358_v4 = vlaneseq  ;;  %s1169_s22 = smov (!%p286_p4, %s671_s22), 63 }
   0xd   : > { %v349_v1 = vld [vmem:[%s1153_s2] sm:$0x1]  ;;  %v348_v2 = vmul.f32 0.001953125, %v347_v0  ;;  %s672_s27 = sshll.u32 %s1169_s22, 3 }
   0xe   : > { %v350_v3 = vmul.f32 0.001953125, %v349_v1  ;;  %v784_v7 = vshrl.u32 %v358_v4, 7  ;;  %s792_s30 = scalar_lea.vmem %s1151_s0, %s672_s27  ;;  %v353_v25 = vld [vmem:[%s1154_s3] sm:$0x1]  ;;  %s984_s12 = scalar_lea.vmem %s1156_s5, %s672_s27 }
   0xf   : > { %v351_v5 = vmul.f32 %v348_v2, %v348_v2  ;;  %v796_v10 = vld [vmem:[%s792_s30] sm:$0xff]  ;;  %v799_v11 = vld [vmem:[%s792_s30 + $0x8] sm:$0xff]  ;;  %v804_v13 = vld [vmem:[%s792_s30 + $0x10] sm:$0xff] }
  0x10   : > { %v360_v9 = vsub.s32 0, %v784_v7  ;;  %v807_v14 = vld [vmem:[%s792_s30 + $0x18] sm:$0xff]  ;;  %v810_v15 = vld [vmem:[%s792_s30 + $0x20] sm:$0xff]  ;;  %v813_v16 = vld [vmem:[%s792_s30 + $0x28] sm:$0xff] }
  0x11   : > { %v352_v6 = vsub.f32 %v350_v3, %v351_v5  ;;  %v816_v17 = vld [vmem:[%s792_s30 + $0x30] sm:$0xff]  ;;  %v819_v18 = vld [vmem:[%s792_s30 + $0x38] sm:$0xff]  ;;  %v822_v19 = vld [vmem:[%s792_s30 + $0x40] sm:$0xff] }
  0x12   : > { %v801_v12 = vrot.slane %v348_v2, %v360_v9  ;;  %v825_v20 = vld [vmem:[%s792_s30 + $0x48] sm:$0xff]  ;;  %v828_v21 = vld [vmem:[%s792_s30 + $0x50] sm:$0xff]  ;;  %v831_v22 = vld [vmem:[%s792_s30 + $0x58] sm:$0xff] }
  0x13   : > { %v354_v8 = vadd.f32 1e-05, %v352_v6  ;;  %v834_v23 = vld [vmem:[%s792_s30 + $0x60] sm:$0xff]  ;;  %v837_v24 = vld [vmem:[%s792_s30 + $0x68] sm:$0xff]  ;;  %v847_v28 = vld [vmem:[%s792_s30 + $0x70] sm:$0xff] }
  0x14   : > { %v363_v26 = vsub.f32 %v796_v10, %v801_v12  ;;  %v364_v27 = vsub.f32 %v799_v11, %v801_v12  ;;  %v850_v29 = vld [vmem:[%s792_s30 + $0x78] sm:$0xff]  ;;  %v853_v30 = vld [vmem:[%s792_s30 + $0x80] sm:$0xff]  ;;  %v365_v31 = vsub.f32 %v804_v13, %v801_v12  ;;  %v366_v32 = vsub.f32 %v807_v14, %v801_v12  ;;  %v864_v35 = vld [vmem:[%s792_s30 + $0x88] sm:$0xff] }
  0x15   : > { %702 = vrsqrt.f32 %v354_v8  ;;  %v367_v33 = vsub.f32 %v810_v15, %v801_v12  ;;  %v368_v34 = vsub.f32 %v813_v16, %v801_v12  ;;  %v867_v36 = vld [vmem:[%s792_s30 + $0x90] sm:$0xff]  ;;  %v870_v37 = vld [vmem:[%s792_s30 + $0x98] sm:$0xff]  ;;  %v369_v38 = vsub.f32 %v816_v17, %v801_v12  ;;  %v881_v42 = vld [vmem:[%s792_s30 + $0xa0] sm:$0xff] }
  0x16   : > { %v370_v39 = vsub.f32 %v819_v18, %v801_v12  ;;  %v371_v40 = vsub.f32 %v822_v19, %v801_v12  ;;  %v372_v41 = vsub.f32 %v825_v20, %v801_v12  ;;  %v884_v43 = vld [vmem:[%s792_s30 + $0xa8] sm:$0xff]  ;;  %v887_v44 = vld [vmem:[%s792_s30 + $0xb0] sm:$0xff]  ;;  %v373_v45 = vsub.f32 %v828_v21, %v801_v12  ;;  %v898_v49 = vld [vmem:[%s792_s30 + $0xb8] sm:$0xff] }
  0x17   : > { %v374_v46 = vsub.f32 %v831_v22, %v801_v12  ;;  %v375_v47 = vsub.f32 %v834_v23, %v801_v12  ;;  %v376_v48 = vsub.f32 %v837_v24, %v801_v12  ;;  %v901_v50 = vld [vmem:[%s792_s30 + $0xc0] sm:$0xff]  ;;  %v904_v51 = vld [vmem:[%s792_s30 + $0xc8] sm:$0xff]  ;;  %v377_v53 = vsub.f32 %v847_v28, %v801_v12  ;;  %v915_v57 = vld [vmem:[%s792_s30 + $0xd0] sm:$0xff] }
  0x18   : > { %v378_v54 = vsub.f32 %v850_v29, %v801_v12  ;;  %v379_v55 = vsub.f32 %v853_v30, %v801_v12  ;;  %v380_v56 = vsub.f32 %v864_v35, %v801_v12  ;;  %v918_v58 = vld [vmem:[%s792_s30 + $0xd8] sm:$0xff]  ;;  %v921_v59 = vld [vmem:[%s792_s30 + $0xe0] sm:$0xff]  ;;  %v381_v61 = vsub.f32 %v867_v36, %v801_v12  ;;  %v930_v0 = vld [vmem:[%s792_s30 + $0xe8] sm:$0xff] }
  0x19   : > { %v382_v62 = vsub.f32 %v870_v37, %v801_v12  ;;  %v383_v63 = vsub.f32 %v881_v42, %v801_v12  ;;  %v933_v1 = vld [vmem:[%s792_s30 + $0xf0] sm:$0xff]  ;;  %v936_v2 = vld [vmem:[%s792_s30 + $0xf8] sm:$0xff]  ;;  %v384_v3 = vsub.f32 %v884_v43, %v801_v12  ;;  %v385_v4 = vsub.f32 %v887_v44, %v801_v12  ;;  %v957_v13 = vld [vmem:[%s1155_s4] ss:$0 sm:$0xff] }
  0x1a   : > { %v386_v5 = vsub.f32 %v898_v49, %v801_v12  ;;  %v387_v6 = vsub.f32 %v901_v50, %v801_v12  ;;  %v1160_v50 = vsub.f32 %v921_v59, %v801_v12 }
  0x22   : > { %v703_v52 = vpop.eup %702 }
  0x23   : > { %v356_v60 = vmul.f32 %v703_v52, %v353_v25 }
  0x25   : > { %v946_v7 = vrot.slane %v356_v60, %v360_v9 }
  0x27   : > { %v401_v17 = vmul.f32 %v946_v7, %v363_v26  ;;  %v402_v18 = vmul.f32 %v946_v7, %v364_v27  ;;  %v403_v25 = vmul.f32 %v946_v7, %v365_v31  ;;  %v404_v52 = vmul.f32 %v946_v7, %v366_v32 }
  0x28   : > { %v405_v60 = vmul.f32 %v946_v7, %v367_v33  ;;  %v406_v14 = vmul.f32 %v946_v7, %v368_v34  ;;  %v407_v9 = vmul.f32 %v946_v7, %v369_v38  ;;  %v408_v11 = vmul.f32 %v946_v7, %v370_v39 }
  0x29   : > { %v440_v15 = vadd.f32 %v957_v13, %v401_v17  ;;  %v441_v16 = vadd.f32 %v957_v13, %v402_v18  ;;  %v442_v26 = vadd.f32 %v957_v13, %v403_v25  ;;  %v443_v27 = vadd.f32 %v957_v13, %v404_v52 }
  0x2a   : > { %v444_v31 = vadd.f32 %v957_v13, %v405_v60  ;;  %v445_v32 = vadd.f32 %v957_v13, %v406_v14  ;;  %v446_v33 = vadd.f32 %v957_v13, %v407_v9  ;;  %v447_v34 = vadd.f32 %v957_v13, %v408_v11 }
  0x2b   : > { %v472_v38 = vmax.f32 %v440_v15, 0.0  ;;  %v473_v39 = vmax.f32 %v441_v16, 0.0  ;;  %v474_v17 = vmax.f32 %v442_v26, 0.0  ;;  %v475_v18 = vmax.f32 %v443_v27, 0.0 }
  0x2c   : > { %v476_v25 = vmax.f32 %v444_v31, 0.0  ;;  %v477_v52 = vmax.f32 %v445_v32, 0.0  ;;  %v478_v10 = vmax.f32 %v446_v33, 0.0  ;;  %v479_v8 = vmax.f32 %v447_v34, 0.0 }
  0x2d   : > { %504 = vst [vmem:[%s984_s12] sm:$0xff] %v472_v38  ;;  %505 = vst [vmem:[%s984_s12 + $0x8] sm:$0xff] %v473_v39  ;;  %v409_v11 = vmul.f32 %v946_v7, %v371_v40  ;;  %v410_v14 = vmul.f32 %v946_v7, %v372_v41  ;;  %v411_v9 = vmul.f32 %v946_v7, %v373_v45 }
  0x2e   : > { %506 = vst [vmem:[%s984_s12 + $0x10] sm:$0xff] %v474_v17  ;;  %507 = vst [vmem:[%s984_s12 + $0x18] sm:$0xff] %v475_v18  ;;  %v412_v15 = vmul.f32 %v946_v7, %v374_v46  ;;  %v413_v19 = vmul.f32 %v946_v7, %v375_v47  ;;  %v414_v20 = vmul.f32 %v946_v7, %v376_v48 }
  0x2f   : > { %508 = vst [vmem:[%s984_s12 + $0x20] sm:$0xff] %v476_v25  ;;  %509 = vst [vmem:[%s984_s12 + $0x28] sm:$0xff] %v477_v52  ;;  %v415_v21 = vmul.f32 %v946_v7, %v377_v53  ;;  %v416_v22 = vmul.f32 %v946_v7, %v378_v54  ;;  %v448_v40 = vadd.f32 %v957_v13, %v409_v11 }
  0x30   : > { %510 = vst [vmem:[%s984_s12 + $0x30] sm:$0xff] %v478_v10  ;;  %511 = vst [vmem:[%s984_s12 + $0x38] sm:$0xff] %v479_v8  ;;  %v449_v23 = vadd.f32 %v957_v13, %v410_v14  ;;  %v450_v24 = vadd.f32 %v957_v13, %v411_v9  ;;  %v451_v41 = vadd.f32 %v957_v13, %v412_v15 }
  0x31   : > { %v452_v28 = vadd.f32 %v957_v13, %v413_v19  ;;  %v453_v45 = vadd.f32 %v957_v13, %v414_v20  ;;  %v454_v29 = vadd.f32 %v957_v13, %v415_v21  ;;  %v455_v46 = vadd.f32 %v957_v13, %v416_v22 }
  0x32   : > { %v480_v47 = vmax.f32 %v448_v40, 0.0  ;;  %v481_v48 = vmax.f32 %v449_v23, 0.0  ;;  %v482_v53 = vmax.f32 %v450_v24, 0.0  ;;  %v483_v54 = vmax.f32 %v451_v41, 0.0 }
  0x33   : > { %v484_v8 = vmax.f32 %v452_v28, 0.0  ;;  %v485_v10 = vmax.f32 %v453_v45, 0.0  ;;  %v486_v16 = vmax.f32 %v454_v29, 0.0  ;;  %v487_v60 = vmax.f32 %v455_v46, 0.0 }
  0x34   : > { %512 = vst [vmem:[%s984_s12 + $0x40] sm:$0xff] %v480_v47  ;;  %513 = vst [vmem:[%s984_s12 + $0x48] sm:$0xff] %v481_v48  ;;  %v417_v26 = vmul.f32 %v946_v7, %v379_v55  ;;  %v418_v27 = vmul.f32 %v946_v7, %v380_v56  ;;  %v419_v31 = vmul.f32 %v946_v7, %v381_v61 }
  0x35   : > { %514 = vst [vmem:[%s984_s12 + $0x50] sm:$0xff] %v482_v53  ;;  %515 = vst [vmem:[%s984_s12 + $0x58] sm:$0xff] %v483_v54  ;;  %v420_v32 = vmul.f32 %v946_v7, %v382_v62  ;;  %v421_v30 = vmul.f32 %v946_v7, %v383_v63  ;;  %v422_v35 = vmul.f32 %v946_v7, %v384_v3 }
  0x36   : > { %516 = vst [vmem:[%s984_s12 + $0x60] sm:$0xff] %v484_v8  ;;  %517 = vst [vmem:[%s984_s12 + $0x68] sm:$0xff] %v485_v10  ;;  %v423_v36 = vmul.f32 %v946_v7, %v385_v4  ;;  %v424_v37 = vmul.f32 %v946_v7, %v386_v5  ;;  %v456_v55 = vadd.f32 %v957_v13, %v417_v26 }
  0x37   : > { %518 = vst [vmem:[%s984_s12 + $0x70] sm:$0xff] %v486_v16  ;;  %519 = vst [vmem:[%s984_s12 + $0x78] sm:$0xff] %v487_v60  ;;  %v457_v42 = vadd.f32 %v957_v13, %v418_v27  ;;  %v458_v43 = vadd.f32 %v957_v13, %v419_v31  ;;  %v459_v56 = vadd.f32 %v957_v13, %v420_v32 }
  0x38   : > { %v460_v44 = vadd.f32 %v957_v13, %v421_v30  ;;  %v461_v61 = vadd.f32 %v957_v13, %v422_v35  ;;  %v462_v49 = vadd.f32 %v957_v13, %v423_v36  ;;  %v463_v62 = vadd.f32 %v957_v13, %v424_v37 }
  0x39   : > { %v488_v63 = vmax.f32 %v456_v55, 0.0  ;;  %v489_v3 = vmax.f32 %v457_v42, 0.0  ;;  %v490_v4 = vmax.f32 %v458_v43, 0.0  ;;  %v491_v5 = vmax.f32 %v459_v56, 0.0 }
  0x3a   : > { %v492_v33 = vmax.f32 %v460_v44, 0.0  ;;  %v493_v34 = vmax.f32 %v461_v61, 0.0  ;;  %v494_v38 = vmax.f32 %v462_v49, 0.0  ;;  %v495_v39 = vmax.f32 %v463_v62, 0.0 }
  0x3b   : > { %520 = vst [vmem:[%s984_s12 + $0x80] sm:$0xff] %v488_v63  ;;  %521 = vst [vmem:[%s984_s12 + $0x88] sm:$0xff] %v489_v3  ;;  %v425_v17 = vmul.f32 %v946_v7, %v387_v6  ;;  %v1157_v18 = vsub.f32 %v904_v51, %v801_v12  ;;  %v1158_v52 = vsub.f32 %v915_v57, %v801_v12 }
  0x3c   : > { %522 = vst [vmem:[%s984_s12 + $0x90] sm:$0xff] %v490_v4  ;;  %523 = vst [vmem:[%s984_s12 + $0x98] sm:$0xff] %v491_v5  ;;  %v1159_v14 = vsub.f32 %v918_v58, %v801_v12  ;;  %v429_v51 = vmul.f32 %v946_v7, %v1160_v50  ;;  %v1161_v6 = vsub.f32 %v930_v0, %v801_v12 }
  0x3d   : > { %v426_v25 = vmul.f32 %v946_v7, %v1157_v18  ;;  %v427_v11 = vmul.f32 %v946_v7, %v1158_v52  ;;  %524 = vst [vmem:[%s984_s12 + $0xa0] sm:$0xff] %v492_v33  ;;  %525 = vst [vmem:[%s984_s12 + $0xa8] sm:$0xff] %v493_v34  ;;  %v1162_v15 = vsub.f32 %v933_v1, %v801_v12 }
  0x3e   : > { %v428_v9 = vmul.f32 %v946_v7, %v1159_v14  ;;  %526 = vst [vmem:[%s984_s12 + $0xb0] sm:$0xff] %v494_v38  ;;  %527 = vst [vmem:[%s984_s12 + $0xb8] sm:$0xff] %v495_v39  ;;  %v430_v57 = vmul.f32 %v946_v7, %v1161_v6  ;;  %v1163_v19 = vsub.f32 %v936_v2, %v801_v12 }
  0x3f   : > { %v431_v58 = vmul.f32 %v946_v7, %v1162_v15  ;;  %v464_v21 = vadd.f32 %v957_v13, %v425_v17  ;;  %v465_v59 = vadd.f32 %v957_v13, %v426_v25  ;;  %v466_v0 = vadd.f32 %v957_v13, %v427_v11 }
  0x40   : > { %v432_v20 = vmul.f32 %v946_v7, %v1163_v19  ;;  %v467_v22 = vadd.f32 %v957_v13, %v428_v9  ;;  %v468_v1 = vadd.f32 %v957_v13, %v429_v51  ;;  %v469_v40 = vadd.f32 %v957_v13, %v430_v57 }
  0x41   : > { %v470_v12 = vadd.f32 %v957_v13, %v431_v58  ;;  %v496_v7 = vmax.f32 %v464_v21, 0.0  ;;  %v497_v23 = vmax.f32 %v465_v59, 0.0  ;;  %v498_v24 = vmax.f32 %v466_v0, 0.0 }
  0x42   : > { %v471_v2 = vadd.f32 %v957_v13, %v432_v20  ;;  %v499_v41 = vmax.f32 %v467_v22, 0.0  ;;  %v500_v28 = vmax.f32 %v468_v1, 0.0  ;;  %v501_v45 = vmax.f32 %v469_v40, 0.0 }
  0x43   : > { %v502_v29 = vmax.f32 %v470_v12, 0.0  ;;  %528 = vst [vmem:[%s984_s12 + $0xc0] sm:$0xff] %v496_v7  ;;  %529 = vst [vmem:[%s984_s12 + $0xc8] sm:$0xff] %v497_v23 }
  0x44   : > { %v503_v46 = vmax.f32 %v471_v2, 0.0  ;;  %530 = vst [vmem:[%s984_s12 + $0xd0] sm:$0xff] %v498_v24  ;;  %531 = vst [vmem:[%s984_s12 + $0xd8] sm:$0xff] %v499_v41 }
  0x45   : > { %532 = vst [vmem:[%s984_s12 + $0xe0] sm:$0xff] %v500_v28  ;;  %533 = vst [vmem:[%s984_s12 + $0xe8] sm:$0xff] %v501_v45 }
  0x46   : > { %534 = vst [vmem:[%s984_s12 + $0xf0] sm:$0xff] %v502_v29  ;;  %535 = vst [vmem:[%s984_s12 + $0xf8] sm:$0xff] %v503_v46 }
  0x47 PF: > { %s15_s20 = sadd.s32 1, %s726_s20   ;;  %s1164_s18 = smov %s722_s19 }
  0x48   : > { %p12_p5 = scmp.ge.s32.totalorder %s15_s20, 4   ;;  %s1165_s19 = smov %s1167_s21 }
  0x4a   :  { %14 = sbr.rel (!%p12_p5) target bundleno = 2 (0x2), region = 82 }

// kernel: basic_block_forward.6
= control target key start
LH: loop header
LB: loop body
LE: loop exit
PB: predicated region body
PF: predicated region fallthrough
CT: control target
= control target key end

     0   :  { %s1095_s15 = smov 0   ;;  %s1097_s16 = smov 0   ;;  %s1369_s0 = inlined_call_operand.vmem [shape: bf16[512,36], index: 0, kind: input, shape index: {}]   ;;  %s1370_s1 = inlined_call_operand.vmem [shape: bf16[36,128], index: 1, kind: input, shape index: {}]   ;;  %s1371_s2 = inlined_call_operand.vmem [shape: f32[512,128], index: 2, kind: output, shape index: {0}]   ;;  %s1372_s3 = inlined_call_operand.vmem [shape: f32[1,128], index: 3, kind: output, shape index: {1}]   ;;  %s1373_s4 = inlined_call_operand.vmem [shape: f32[1,128], index: 4, kind: output, shape index: {2}]  }
   0x1   :  { %s1099_s17 = smov 0  }
   0x2 LB: > { %s24_s18 = sadd.s32 1, %s1063_s16  ;;  %p891_p0 = scmp.ge.s32.totalorder %s1067_s17, 1  ;;  %s1067_s17 = sphi %s1099_s17, %s15_s17   ;;  %s1063_s16 = sphi %s1097_s16, %s1375_s16   ;;  %s1059_s15 = sphi %s1095_s15, %s1374_s15  }
   0x3   : > { %p25_p1 = scmp.ge.s32.totalorder %s24_s18, 2  ;;  %p191_p2 = scmp.lt.s32.totalorder %s1067_s17, 3 }
   0x5   : > { %s1377_s18 = smov (%p25_p1, %s24_s18), 0  ;;  %p192_p3 = pnand %p891_p0, %p191_p2 }
   0x6   : > { %s892_s23 = sshll.u32 (!%p192_p3), %s1059_s15, 5  ;;  %p931_p5 = scmp.ne.s32.totalorder (!%p192_p3), %s1059_s15, 0 }
   0x7   : > { %195 = sbr.rel (%p192_p3) target bundleno = 330 (0x14a), region = 28  ;;  %p231_p4 = scmp.lt.s32.totalorder (!%p192_p3), %s892_s23, 63 }
   0xc   : > { %v1026_v0 = vld [vmem:[%s1370_s1 + $0x10] ss:$0 sps:$4 sm:$0x33]   ;;  %vm437_vm0 = vcmask 1041408   ;;  %v1027_v1 = vld [vmem:[%s1370_s1 + $0x8] sm:$0xff]   ;;  %v1028_v3 = vld [vmem:[%s1370_s1] sm:$0xff]  }
   0xd   : > { %999 = vmatprep.subr.msk.bf16.mxu0 %vm437_vm0, %v1026_v0  ;;  %1000 = vmatprep.subr.msk.bf16.mxu1 %vm437_vm0, %v1026_v0  ;;  %v439_v2 = vsel %vm437_vm0, %v1026_v0, 0  ;;  %s1379_s23 = smov (!%p231_p4, %s892_s23), 63  ;;  %vm388_vm1 = vcmask 293888  }
   0xe   : > { %956 = vmatpush3.bf16.msra.mxu0 %v439_v2  ;;  %996 = vmatpush3.bf16.msra.mxu1 %v439_v2  ;;  %s893_s26 = sshll.u32 %s1379_s23, 2  ;;  %s895_s30 = sshll.u32 %s1379_s23, 3 }
   0xf   : > { %957 = vmatprep.subr.bf16.mxu0 %v1027_v1  ;;  %994 = vmatprep.subr.bf16.mxu1 %v1027_v1  ;;  %s1131_s29 = scalar_lea.vmem %s1369_s0, %s893_s26  ;;  %s1169_s7 = scalar_lea.vmem %s1371_s2, %s895_s30 }
  0x10   : > { %v1029_v4 = vld [vmem:[%s1131_s29] sm:$0xff]   ;;  %v1031_v6 = vld [vmem:[%s1131_s29 + $0x8] sm:$0xff]   ;;  %v1033_v8 = vld [vmem:[%s1131_s29 + $0x10] sm:$0xff]  }
  0x11   : > { %v1030_v5 = vld [vmem:[%s1131_s29 + $0x40] sm:$0xff]   ;;  %961 = vmatprep.mubr.msk.bf16.mxu0 %vm388_vm1, %v1029_v4  ;;  %v1032_v7 = vld [vmem:[%s1131_s29 + $0x48] sm:$0xff]   ;;  %v1034_v9 = vld [vmem:[%s1131_s29 + $0x50] sm:$0xff]  }
  0x12   : > { %958 = vmatpush3.bf16.msra.mxu0 %v1027_v1  ;;  %997 = vmatpush3.bf16.msra.mxu1 %v1027_v1  ;;  %v1035_v10 = vld [vmem:[%s1131_s29 + $0x18] sm:$0xff]   ;;  %v1037_v12 = vld [vmem:[%s1131_s29 + $0x20] sm:$0xff]   ;;  %v1039_v14 = vld [vmem:[%s1131_s29 + $0x28] sm:$0xff]  }
  0x13   : > { %959 = vmatprep.subr.bf16.mxu0 %v1028_v3  ;;  %995 = vmatprep.subr.bf16.mxu1 %v1028_v3  ;;  %v1036_v11 = vld [vmem:[%s1131_s29 + $0x58] sm:$0xff]   ;;  %v1038_v13 = vld [vmem:[%s1131_s29 + $0x60] sm:$0xff]   ;;  %v1040_v15 = vld [vmem:[%s1131_s29 + $0x68] sm:$0xff]  }
  0x14   : > { %977 = vmatprep.mubr.msk.bf16.mxu1 %vm388_vm1, %v1030_v5  ;;  %v1041_v16 = vld [vmem:[%s1131_s29 + $0x30] sm:$0xff]   ;;  %v1043_v18 = vld [vmem:[%s1131_s29 + $0x38] sm:$0xff]  }
  0x15   : > { %v1042_v17 = vld [vmem:[%s1131_s29 + $0x70] sm:$0xff]   ;;  %v1044_v19 = vld [vmem:[%s1131_s29 + $0x78] sm:$0xff]  }
  0x16   : > { %960 = vmatpush3.bf16.msra.mxu0 %v1028_v3  ;;  %998 = vmatpush3.bf16.msra.mxu1 %v1028_v3 }
  0x19   : > { %962 = vmatmul.mubr.msk.bf16.vlgmr.msra.gmra.mxu0 %vm388_vm1, %v1031_v6  ;;  %978 = vmatmul.mubr.msk.bf16.vlgmr.msra.gmra.mxu1 %vm388_vm1, %v1032_v7 }
  0x1a   : > { %965 = vmatprep.mubr.msk.bf16.mxu0 %vm388_vm1, %v1033_v8  ;;  %981 = vmatprep.mubr.msk.bf16.mxu1 %vm388_vm1, %v1034_v9 }
  0x21   : > { %966 = vmatmul.mubr.msk.bf16.gmra.mxu0 %vm388_vm1, %v1035_v10  ;;  %982 = vmatmul.mubr.msk.bf16.gmra.mxu1 %vm388_vm1, %v1036_v11 }
  0x22   : > { %969 = vmatprep.mubr.msk.bf16.mxu0 %vm388_vm1, %v1037_v12  ;;  %985 = vmatprep.mubr.msk.bf16.mxu1 %vm388_vm1, %v1038_v13 }
  0x29   : > { %970 = vmatmul.mubr.msk.bf16.gmra.mxu0 %vm388_vm1, %v1039_v14  ;;  %986 = vmatmul.mubr.msk.bf16.gmra.mxu1 %vm388_vm1, %v1040_v15 }
  0x2a   : > { %973 = vmatprep.mubr.msk.bf16.mxu0 %vm388_vm1, %v1041_v16  ;;  %989 = vmatprep.mubr.msk.bf16.mxu1 %vm388_vm1, %v1042_v17 }
  0x31   : > { %974 = vmatmul.mubr.msk.bf16.gmra.mxu0 %vm388_vm1, %v1043_v18  ;;  %990 = vmatmul.mubr.msk.bf16.gmra.mxu1 %vm388_vm1, %v1044_v19 }
  0xd9   : > { %v1171_v20 = vpop.f32.mrf.mxu0  ;;  %v1173_v21 = vpop.f32.mrf.mxu1 }
  0xda   : > { %604 = vst [vmem:[%s1169_s7 + $0x10] sm:$0xff] %v1171_v20  ;;  %620 = vst [vmem:[%s1169_s7 + $0x90] sm:$0xff] %v1173_v21 }
  0xdb   : > { %v1179_v22 = vpop.f32.mrf.mxu0  ;;  %v1181_v23 = vpop.f32.mrf.mxu1 }
  0xdc   : > { %602 = vst [vmem:[%s1169_s7] sm:$0xff] %v1179_v22  ;;  %618 = vst [vmem:[%s1169_s7 + $0x80] sm:$0xff] %v1181_v23 }
  0xdd   : > { %v1187_v24 = vpop.f32.mrf.mxu0  ;;  %v1189_v25 = vpop.f32.mrf.mxu1 }
  0xde   : > { %605 = vst [vmem:[%s1169_s7 + $0x18] sm:$0xff] %v1187_v24  ;;  %621 = vst [vmem:[%s1169_s7 + $0x98] sm:$0xff] %v1189_v25 }
  0xdf   : > { %v478_v26 = vpop.f32.mrf.mxu0  ;;  %v1195_v27 = vpop.f32.mrf.mxu1 }
  0xe0   : > { %603 = vst [vmem:[%s1169_s7 + $0x8] sm:$0xff] %v478_v26  ;;  %619 = vst [vmem:[%s1169_s7 + $0x88] sm:$0xff] %v1195_v27 }
  0xe1   : > { %v1200_v28 = vpop.f32.mrf.mxu0  ;;  %v1202_v29 = vpop.f32.mrf.mxu1 }
  0xe2   : > { %608 = vst [vmem:[%s1169_s7 + $0x30] sm:$0xff] %v1200_v28  ;;  %624 = vst [vmem:[%s1169_s7 + $0xb0] sm:$0xff] %v1202_v29 }
  0xe3   : > { %v491_v30 = vpop.f32.mrf.mxu0  ;;  %v1208_v31 = vpop.f32.mrf.mxu1 }
  0xe4   : > { %606 = vst [vmem:[%s1169_s7 + $0x20] sm:$0xff] %v491_v30  ;;  %622 = vst [vmem:[%s1169_s7 + $0xa0] sm:$0xff] %v1208_v31 }
  0xe5   : > { %v1213_v32 = vpop.f32.mrf.mxu0  ;;  %v1215_v33 = vpop.f32.mrf.mxu1 }
  0xe6   : > { %609 = vst [vmem:[%s1169_s7 + $0x38] sm:$0xff] %v1213_v32  ;;  %625 = vst [vmem:[%s1169_s7 + $0xb8] sm:$0xff] %v1215_v33 }
  0xe7   : > { %v494_v34 = vpop.f32.mrf.mxu0  ;;  %v1221_v35 = vpop.f32.mrf.mxu1 }
  0xe8   : > { %607 = vst [vmem:[%s1169_s7 + $0x28] sm:$0xff] %v494_v34  ;;  %623 = vst [vmem:[%s1169_s7 + $0xa8] sm:$0xff] %v1221_v35 }
  0xe9   : > { %v1226_v36 = vpop.f32.mrf.mxu0  ;;  %v1228_v37 = vpop.f32.mrf.mxu1 }
  0xea   : > { %612 = vst [vmem:[%s1169_s7 + $0x50] sm:$0xff] %v1226_v36  ;;  %628 = vst [vmem:[%s1169_s7 + $0xd0] sm:$0xff] %v1228_v37 }
  0xeb   : > { %v507_v38 = vpop.f32.mrf.mxu0  ;;  %v1234_v39 = vpop.f32.mrf.mxu1 }
  0xec   : > { %610 = vst [vmem:[%s1169_s7 + $0x40] sm:$0xff] %v507_v38  ;;  %626 = vst [vmem:[%s1169_s7 + $0xc0] sm:$0xff] %v1234_v39 }
  0xed   : > { %v972_v40 = vpop.f32.mrf.mxu0  ;;  %v1239_v41 = vpop.f32.mrf.mxu1 }
  0xee   : > { %613 = vst [vmem:[%s1169_s7 + $0x58] sm:$0xff] %v972_v40  ;;  %629 = vst [vmem:[%s1169_s7 + $0xd8] sm:$0xff] %v1239_v41 }
  0xef   : > { %v510_v42 = vpop.f32.mrf.mxu0  ;;  %v1244_v43 = vpop.f32.mrf.mxu1 }
  0xf0   : > { %611 = vst [vmem:[%s1169_s7 + $0x48] sm:$0xff] %v510_v42  ;;  %627 = vst [vmem:[%s1169_s7 + $0xc8] sm:$0xff] %v1244_v43 }
  0xf1   : > { %v1249_v44 = vpop.f32.mrf.mxu0  ;;  %v1251_v45 = vpop.f32.mrf.mxu1 }
  0xf2   : > { %616 = vst [vmem:[%s1169_s7 + $0x70] sm:$0xff] %v1249_v44  ;;  %632 = vst [vmem:[%s1169_s7 + $0xf0] sm:$0xff] %v1251_v45 }
  0xf3   : > { %v523_v46 = vpop.f32.mrf.mxu0  ;;  %v1257_v47 = vpop.f32.mrf.mxu1 }
  0xf4   : > { %614 = vst [vmem:[%s1169_s7 + $0x60] sm:$0xff] %v523_v46  ;;  %630 = vst [vmem:[%s1169_s7 + $0xe0] sm:$0xff] %v1257_v47  ;;  %637 = sbr.rel (%p931_p5) target bundleno = 251 (0xfb), region = 32 }
  0xf5   : > { %v976_v48 = vpop.f32.mrf.mxu0  ;;  %v1262_v49 = vpop.f32.mrf.mxu1 }
  0xf6   : > { %617 = vst [vmem:[%s1169_s7 + $0x78] sm:$0xff] %v976_v48  ;;  %633 = vst [vmem:[%s1169_s7 + $0xf8] sm:$0xff] %v1262_v49 }
  0xf7   : > { %v526_v50 = vpop.f32.mrf.mxu0  ;;  %v1267_v51 = vpop.f32.mrf.mxu1 }
  0xf8   : > { %615 = vst [vmem:[%s1169_s7 + $0x68] sm:$0xff] %v526_v50  ;;  %631 = vst [vmem:[%s1169_s7 + $0xe8] sm:$0xff] %v1267_v51 }
  0xf9   : > { %v1069_v52 = vmov 0.0  }
  0xfa   : > { %638 = vst [vmem:[%s1372_s3] sm:$0x1] %v1069_v52  ;;  %639 = vst [vmem:[%s1373_s4] sm:$0x1] %v1069_v52 }
  0xfb PF: > { %v641_v53 = vadd.f32 %v478_v26, %v1179_v22  ;;  %v681_v56 = vmul.f32 %v1179_v22, %v1179_v22  ;;  %v682_v57 = vmul.f32 %v478_v26, %v478_v26  ;;  %v683_v59 = vmul.f32 %v1171_v20, %v1171_v20 }
  0xfc   : > { %v684_v61 = vmul.f32 %v1187_v24, %v1187_v24  ;;  %v685_v0 = vmul.f32 %v491_v30, %v491_v30  ;;  %v686_v3 = vmul.f32 %v494_v34, %v494_v34  ;;  %v687_v6 = vmul.f32 %v1200_v28, %v1200_v28 }
  0xfd   : > { %v642_v54 = vadd.f32 %v1171_v20, %v641_v53  ;;  %v713_v62 = vadd.f32 %v682_v57, %v681_v56  ;;  %v688_v9 = vmul.f32 %v1213_v32, %v1213_v32  ;;  %v689_v12 = vmul.f32 %v507_v38, %v507_v38 }
  0xfe   : > { %v690_v15 = vmul.f32 %v510_v42, %v510_v42  ;;  %v691_v18 = vmul.f32 %v1226_v36, %v1226_v36  ;;  %v692_v22 = vmul.f32 %v972_v40, %v972_v40  ;;  %v697_v56 = vmul.f32 %v1181_v23, %v1181_v23 }
  0xff   : > { %v643_v55 = vadd.f32 %v1187_v24, %v642_v54  ;;  %v714_v1 = vadd.f32 %v713_v62, %v683_v59 }
 0x101   : > { %v644_v58 = vadd.f32 %v643_v55, %v491_v30  ;;  %v715_v4 = vadd.f32 %v714_v1, %v684_v61  ;;  %v700_v61 = vmul.f32 %v1189_v25, %v1189_v25  ;;  %v702_v1 = vmul.f32 %v1221_v35, %v1221_v35 }
 0x103   : > { %v645_v60 = vadd.f32 %v644_v58, %v494_v34  ;;  %v716_v7 = vadd.f32 %v715_v4, %v685_v0  ;;  %v694_v34 = vmul.f32 %v526_v50, %v526_v50 }
 0x105   : > { %v646_v63 = vadd.f32 %v1200_v28, %v645_v60  ;;  %v717_v10 = vadd.f32 %v716_v7, %v686_v3  ;;  %v693_v28 = vmul.f32 %v523_v46, %v523_v46  ;;  %v703_v3 = vmul.f32 %v1202_v29, %v1202_v29 }
 0x106   : > { %v705_v7 = vmul.f32 %v1234_v39, %v1234_v39 }
 0x107   : > { %v647_v2 = vadd.f32 %v1213_v32, %v646_v63  ;;  %v718_v13 = vadd.f32 %v717_v10, %v687_v6  ;;  %v701_v63 = vmul.f32 %v1208_v31, %v1208_v31 }
 0x109   : > { %v648_v5 = vadd.f32 %v647_v2, %v507_v38  ;;  %v719_v16 = vadd.f32 %v718_v13, %v688_v9  ;;  %v706_v9 = vmul.f32 %v1244_v43, %v1244_v43  ;;  %v708_v13 = vmul.f32 %v1239_v41, %v1239_v41 }
 0x10b   : > { %v649_v8 = vadd.f32 %v648_v5, %v510_v42  ;;  %v720_v19 = vadd.f32 %v719_v16, %v689_v12  ;;  %v695_v42 = vmul.f32 %v1249_v44, %v1249_v44  ;;  %v704_v5 = vmul.f32 %v1215_v33, %v1215_v33 }
 0x10d   : > { %v650_v11 = vadd.f32 %v1226_v36, %v649_v8  ;;  %v721_v24 = vadd.f32 %v720_v19, %v690_v15  ;;  %v696_v36 = vmul.f32 %v976_v48, %v976_v48  ;;  %v709_v15 = vmul.f32 %v1257_v47, %v1257_v47 }
 0x10e   : > { %v711_v19 = vmul.f32 %v1251_v45, %v1251_v45 }
 0x10f   : > { %v651_v14 = vadd.f32 %v972_v40, %v650_v11  ;;  %v722_v30 = vadd.f32 %v721_v24, %v691_v18  ;;  %v707_v11 = vmul.f32 %v1228_v37, %v1228_v37 }
 0x111   : > { %v652_v17 = vadd.f32 %v651_v14, %v523_v46  ;;  %v723_v52 = vadd.f32 %v722_v30, %v692_v22 }
 0x113   : > { %v653_v20 = vadd.f32 %v652_v17, %v526_v50  ;;  %v724_v53 = vadd.f32 %v723_v52, %v693_v28  ;;  %v698_v50 = vmul.f32 %v1195_v27, %v1195_v27  ;;  %v710_v17 = vmul.f32 %v1267_v51, %v1267_v51 }
 0x115   : > { %v654_v26 = vadd.f32 %v1249_v44, %v653_v20  ;;  %v725_v55 = vadd.f32 %v724_v53, %v694_v34  ;;  %v699_v44 = vmul.f32 %v1173_v21, %v1173_v21 }
 0x117   : > { %v655_v32 = vadd.f32 %v976_v48, %v654_v26  ;;  %v726_v46 = vadd.f32 %v725_v55, %v695_v42 }
 0x119   : > { %v656_v38 = vadd.f32 %v655_v32, %v1181_v23  ;;  %v727_v58 = vadd.f32 %v726_v46, %v696_v36 }
 0x11b   : > { %v657_v54 = vadd.f32 %v656_v38, %v1195_v27  ;;  %v728_v60 = vadd.f32 %v727_v58, %v697_v56 }
 0x11d   : > { %v658_v40 = vadd.f32 %v1173_v21, %v657_v54  ;;  %v729_v62 = vadd.f32 %v728_v60, %v698_v50  ;;  %v680_v54 = vld [vmem:[%s1373_s4] sm:$0x1] }
 0x11f   : > { %v659_v57 = vadd.f32 %v1189_v25, %v658_v40  ;;  %v730_v0 = vadd.f32 %v729_v62, %v699_v44 }
 0x121   : > { %v660_v59 = vadd.f32 %v659_v57, %v1208_v31  ;;  %v731_v2 = vadd.f32 %v730_v0, %v700_v61 }
 0x123   : > { %v661_v48 = vadd.f32 %v660_v59, %v1221_v35  ;;  %v732_v4 = vadd.f32 %v731_v2, %v701_v63 }
 0x125   : > { %v662_v23 = vadd.f32 %v1202_v29, %v661_v48  ;;  %v733_v6 = vadd.f32 %v732_v4, %v702_v1 }
 0x127   : > { %v663_v27 = vadd.f32 %v1215_v33, %v662_v23  ;;  %v734_v8 = vadd.f32 %v733_v6, %v703_v3 }
 0x129   : > { %v664_v21 = vadd.f32 %v663_v27, %v1234_v39  ;;  %v735_v10 = vadd.f32 %v734_v8, %v704_v5 }
 0x12b   : > { %v665_v25 = vadd.f32 %v664_v21, %v1244_v43  ;;  %v736_v12 = vadd.f32 %v735_v10, %v705_v7 }
 0x12d   : > { %v666_v31 = vadd.f32 %v1228_v37, %v665_v25  ;;  %v737_v14 = vadd.f32 %v736_v12, %v706_v9 }
 0x12f   : > { %v667_v35 = vadd.f32 %v1239_v41, %v666_v31  ;;  %v738_v16 = vadd.f32 %v737_v14, %v707_v11  ;;  %v712_v41 = vmul.f32 %v1262_v49, %v1262_v49 }
 0x131   : > { %v668_v29 = vadd.f32 %v667_v35, %v1257_v47  ;;  %v739_v18 = vadd.f32 %v738_v16, %v708_v13 }
 0x133   : > { %v669_v33 = vadd.f32 %v668_v29, %v1267_v51  ;;  %v740_v20 = vadd.f32 %v739_v18, %v709_v15  ;;  %v640_v51 = vld [vmem:[%s1372_s3] sm:$0x1] }
 0x135   : > { %v670_v39 = vadd.f32 %v1251_v45, %v669_v33  ;;  %v741_v24 = vadd.f32 %v740_v20, %v710_v17 }
 0x137   : > { %v671_v43 = vadd.f32 %v1262_v49, %v670_v39  ;;  %v742_v28 = vadd.f32 %v741_v24, %v711_v19 }
 0x139   : > { %v672_v37 = vrot.slane %v671_v43, 4  ;;  %v743_v30 = vadd.f32 %v742_v28, %v712_v41 }
 0x13b   : > { %v673_v22 = vadd.f32 %v672_v37, %v671_v43  ;;  %v744_v34 = vrot.slane %v743_v30, 4 }
 0x13d   : > { %v674_v26 = vrot.slane %v673_v22, 2  ;;  %v745_v38 = vadd.f32 %v744_v34, %v743_v30 }
 0x13f   : > { %v675_v47 = vadd.f32 %v674_v26, %v673_v22  ;;  %v746_v45 = vrot.slane %v745_v38, 2 }
 0x141   : > { %v676_v32 = vrot.slane %v675_v47, 1  ;;  %v747_v49 = vadd.f32 %v746_v45, %v745_v38 }
 0x143   : > { %v677_v52 = vadd.f32 %v676_v32, %v675_v47  ;;  %v748_v53 = vrot.slane %v747_v49, 1 }
 0x145   : > { %v678_v42 = vadd.f32 %v677_v52, %v640_v51  ;;  %v749_v36 = vadd.f32 %v748_v53, %v747_v49 }
 0x147   : > { %679 = vst [vmem:[%s1372_s3] sm:$0x1] %v678_v42  ;;  %v750_v55 = vadd.f32 %v749_v36, %v680_v54 }
 0x149   : > { %751 = vst [vmem:[%s1373_s4] sm:$0x1] %v750_v55 }
 0x14a PF: > { %s15_s17 = sadd.s32 1, %s1067_s17   ;;  %s1374_s15 = smov %s1063_s16 }
 0x14b   : > { %p12_p6 = scmp.ge.s32.totalorder %s15_s17, 4   ;;  %s1375_s16 = smov %s1377_s18 }
 0x14d   :  { %14 = sbr.rel (!%p12_p6) target bundleno = 2 (0x2), region = 89 }

// kernel: basic_block_forward.10
= control target key start
LH: loop header
LB: loop body
LE: loop exit
PB: predicated region body
PF: predicated region fallthrough
CT: control target
= control target key end

     0   :  { %s1125_s15 = smov 0   ;;  %s1127_s16 = smov 0   ;;  %s1405_s0 = inlined_call_operand.vmem [shape: bf16[512,72], index: 0, kind: input, shape index: {}]   ;;  %s1406_s1 = inlined_call_operand.vmem [shape: bf16[72,128], index: 1, kind: input, shape index: {}]   ;;  %s1407_s2 = inlined_call_operand.vmem [shape: f32[512,128], index: 2, kind: output, shape index: {0}]   ;;  %s1408_s3 = inlined_call_operand.vmem [shape: f32[1,128], index: 3, kind: output, shape index: {1}]   ;;  %s1409_s4 = inlined_call_operand.vmem [shape: f32[1,128], index: 4, kind: output, shape index: {2}]  }
   0x1   :  { %s1129_s17 = smov 0  }
   0x2 LB: > { %s24_s18 = sadd.s32 1, %s1093_s16  ;;  %p907_p0 = scmp.ge.s32.totalorder %s1097_s17, 1  ;;  %s1097_s17 = sphi %s1129_s17, %s15_s17   ;;  %s1093_s16 = sphi %s1127_s16, %s1411_s16   ;;  %s1089_s15 = sphi %s1125_s15, %s1410_s15  }
   0x3   : > { %p25_p1 = scmp.ge.s32.totalorder %s24_s18, 2  ;;  %p191_p2 = scmp.lt.s32.totalorder %s1097_s17, 3 }
   0x5   : > { %s1413_s18 = smov (%p25_p1, %s24_s18), 0  ;;  %p192_p3 = pnand %p907_p0, %p191_p2 }
   0x6   : > { %s908_s23 = sshll.u32 (!%p192_p3), %s1089_s15, 5  ;;  %p949_p5 = scmp.ne.s32.totalorder (!%p192_p3), %s1089_s15, 0 }
   0x7   : > { %195 = sbr.rel (%p192_p3) target bundleno = 338 (0x152), region = 28  ;;  %p231_p4 = scmp.lt.s32.totalorder (!%p192_p3), %s908_s23, 63 }
   0xc   : > { %v1054_v0 = vld [vmem:[%s1406_s1 + $0x20] ss:$0 sps:$4 sm:$0xff]   ;;  %vm453_vm0 = vcmask 1043456   ;;  %v1055_v1 = vld [vmem:[%s1406_s1 + $0x18] sm:$0xff]   ;;  %v1056_v3 = vld [vmem:[%s1406_s1 + $0x10] sm:$0xff]   ;;  %s1415_s23 = smov (!%p231_p4, %s908_s23), 63 }
   0xd   : > { %1027 = vmatprep.subr.msk.bf16.mxu0 %vm453_vm0, %v1054_v0  ;;  %1028 = vmatprep.subr.msk.bf16.mxu1 %vm453_vm0, %v1054_v0  ;;  %v455_v2 = vsel %vm453_vm0, %v1054_v0, 0  ;;  %v1057_v4 = vld [vmem:[%s1406_s1 + $0x8] sm:$0xff]   ;;  %s909_s28 = sshll.u32 %s1415_s23, 2  ;;  %vm404_vm1 = vcmask 588800   ;;  %v1058_v7 = vld [vmem:[%s1406_s1] sm:$0xff]   ;;  %s911_s8 = sshll.u32 %s1415_s23, 3 }
   0xe   : > { %976 = vmatpush3.bf16.msra.mxu0 %v455_v2  ;;  %1022 = vmatpush3.bf16.msra.mxu1 %v455_v2  ;;  %s1164_s5 = scalar_lea.vmem %s1405_s0, %s909_s28  ;;  %s1205_s11 = scalar_lea.vmem %s1407_s2, %s911_s8 }
   0xf   : > { %977 = vmatprep.subr.bf16.mxu0 %v1055_v1  ;;  %1018 = vmatprep.subr.bf16.mxu1 %v1055_v1  ;;  %v1059_v5 = vld [vmem:[%s1164_s5] sm:$0xff]   ;;  %v1061_v8 = vld [vmem:[%s1164_s5 + $0x8] sm:$0xff]   ;;  %v1063_v10 = vld [vmem:[%s1164_s5 + $0x10] sm:$0xff]  }
  0x10   : > { %v1060_v6 = vld [vmem:[%s1164_s5 + $0x40] sm:$0xff]   ;;  %985 = vmatprep.mubr.msk.bf16.mxu0 %vm404_vm1, %v1059_v5  ;;  %v1062_v9 = vld [vmem:[%s1164_s5 + $0x48] sm:$0xff]   ;;  %v1064_v11 = vld [vmem:[%s1164_s5 + $0x50] sm:$0xff]  }
  0x11   : > { %1001 = vmatprep.mubr.msk.bf16.mxu1 %vm404_vm1, %v1060_v6  ;;  %v1065_v12 = vld [vmem:[%s1164_s5 + $0x18] sm:$0xff]   ;;  %v1067_v14 = vld [vmem:[%s1164_s5 + $0x20] sm:$0xff]   ;;  %v1069_v16 = vld [vmem:[%s1164_s5 + $0x28] sm:$0xff]  }
  0x12   : > { %978 = vmatpush3.bf16.msra.mxu0 %v1055_v1  ;;  %1023 = vmatpush3.bf16.msra.mxu1 %v1055_v1  ;;  %v1066_v13 = vld [vmem:[%s1164_s5 + $0x58] sm:$0xff]   ;;  %v1068_v15 = vld [vmem:[%s1164_s5 + $0x60] sm:$0xff]   ;;  %v1070_v17 = vld [vmem:[%s1164_s5 + $0x68] sm:$0xff]  }
  0x13   : > { %979 = vmatprep.subr.bf16.mxu0 %v1056_v3  ;;  %1019 = vmatprep.subr.bf16.mxu1 %v1056_v3  ;;  %v1071_v18 = vld [vmem:[%s1164_s5 + $0x30] sm:$0xff]   ;;  %v1073_v20 = vld [vmem:[%s1164_s5 + $0x38] sm:$0xff]  }
  0x14   : > { %v1072_v19 = vld [vmem:[%s1164_s5 + $0x70] sm:$0xff]   ;;  %v1074_v21 = vld [vmem:[%s1164_s5 + $0x78] sm:$0xff]  }
  0x16   : > { %980 = vmatpush3.bf16.msra.mxu0 %v1056_v3  ;;  %1024 = vmatpush3.bf16.msra.mxu1 %v1056_v3 }
  0x17   : > { %981 = vmatprep.subr.bf16.mxu0 %v1057_v4  ;;  %1020 = vmatprep.subr.bf16.mxu1 %v1057_v4 }
  0x1a   : > { %982 = vmatpush3.bf16.msra.mxu0 %v1057_v4  ;;  %1025 = vmatpush3.bf16.msra.mxu1 %v1057_v4 }
  0x1b   : > { %983 = vmatprep.subr.bf16.mxu0 %v1058_v7  ;;  %1021 = vmatprep.subr.bf16.mxu1 %v1058_v7 }
  0x1e   : > { %984 = vmatpush3.bf16.msra.mxu0 %v1058_v7  ;;  %1026 = vmatpush3.bf16.msra.mxu1 %v1058_v7 }
  0x21   : > { %986 = vmatmul.mubr.msk.bf16.vlgmr.msra.gmra.mxu0 %vm404_vm1, %v1061_v8  ;;  %1002 = vmatmul.mubr.msk.bf16.vlgmr.msra.gmra.mxu1 %vm404_vm1, %v1062_v9 }
  0x22   : > { %989 = vmatprep.mubr.msk.bf16.mxu0 %vm404_vm1, %v1063_v10  ;;  %1005 = vmatprep.mubr.msk.bf16.mxu1 %vm404_vm1, %v1064_v11 }
  0x29   : > { %990 = vmatmul.mubr.msk.bf16.gmra.mxu0 %vm404_vm1, %v1065_v12  ;;  %1006 = vmatmul.mubr.msk.bf16.gmra.mxu1 %vm404_vm1, %v1066_v13 }
  0x2a   : > { %993 = vmatprep.mubr.msk.bf16.mxu0 %vm404_vm1, %v1067_v14  ;;  %1009 = vmatprep.mubr.msk.bf16.mxu1 %vm404_vm1, %v1068_v15 }
  0x31   : > { %994 = vmatmul.mubr.msk.bf16.gmra.mxu0 %vm404_vm1, %v1069_v16  ;;  %1010 = vmatmul.mubr.msk.bf16.gmra.mxu1 %vm404_vm1, %v1070_v17 }
  0x32   : > { %997 = vmatprep.mubr.msk.bf16.mxu0 %vm404_vm1, %v1071_v18  ;;  %1013 = vmatprep.mubr.msk.bf16.mxu1 %vm404_vm1, %v1072_v19 }
  0x39   : > { %998 = vmatmul.mubr.msk.bf16.gmra.mxu0 %vm404_vm1, %v1073_v20  ;;  %1014 = vmatmul.mubr.msk.bf16.gmra.mxu1 %vm404_vm1, %v1074_v21 }
  0xe1   : > { %v1207_v22 = vpop.f32.mrf.mxu0  ;;  %v1209_v23 = vpop.f32.mrf.mxu1 }
  0xe2   : > { %620 = vst [vmem:[%s1205_s11 + $0x10] sm:$0xff] %v1207_v22  ;;  %636 = vst [vmem:[%s1205_s11 + $0x90] sm:$0xff] %v1209_v23 }
  0xe3   : > { %v1215_v24 = vpop.f32.mrf.mxu0  ;;  %v1217_v25 = vpop.f32.mrf.mxu1 }
  0xe4   : > { %618 = vst [vmem:[%s1205_s11] sm:$0xff] %v1215_v24  ;;  %634 = vst [vmem:[%s1205_s11 + $0x80] sm:$0xff] %v1217_v25 }
  0xe5   : > { %v1223_v26 = vpop.f32.mrf.mxu0  ;;  %v1225_v27 = vpop.f32.mrf.mxu1 }
  0xe6   : > { %621 = vst [vmem:[%s1205_s11 + $0x18] sm:$0xff] %v1223_v26  ;;  %637 = vst [vmem:[%s1205_s11 + $0x98] sm:$0xff] %v1225_v27 }
  0xe7   : > { %v494_v28 = vpop.f32.mrf.mxu0  ;;  %v1231_v29 = vpop.f32.mrf.mxu1 }
  0xe8   : > { %619 = vst [vmem:[%s1205_s11 + $0x8] sm:$0xff] %v494_v28  ;;  %635 = vst [vmem:[%s1205_s11 + $0x88] sm:$0xff] %v1231_v29 }
  0xe9   : > { %v1236_v30 = vpop.f32.mrf.mxu0  ;;  %v1238_v31 = vpop.f32.mrf.mxu1 }
  0xea   : > { %624 = vst [vmem:[%s1205_s11 + $0x30] sm:$0xff] %v1236_v30  ;;  %640 = vst [vmem:[%s1205_s11 + $0xb0] sm:$0xff] %v1238_v31 }
  0xeb   : > { %v507_v32 = vpop.f32.mrf.mxu0  ;;  %v1244_v33 = vpop.f32.mrf.mxu1 }
  0xec   : > { %622 = vst [vmem:[%s1205_s11 + $0x20] sm:$0xff] %v507_v32  ;;  %638 = vst [vmem:[%s1205_s11 + $0xa0] sm:$0xff] %v1244_v33 }
  0xed   : > { %v1249_v34 = vpop.f32.mrf.mxu0  ;;  %v1251_v35 = vpop.f32.mrf.mxu1 }
  0xee   : > { %625 = vst [vmem:[%s1205_s11 + $0x38] sm:$0xff] %v1249_v34  ;;  %641 = vst [vmem:[%s1205_s11 + $0xb8] sm:$0xff] %v1251_v35 }
  0xef   : > { %v510_v36 = vpop.f32.mrf.mxu0  ;;  %v1257_v37 = vpop.f32.mrf.mxu1 }
  0xf0   : > { %623 = vst [vmem:[%s1205_s11 + $0x28] sm:$0xff] %v510_v36  ;;  %639 = vst [vmem:[%s1205_s11 + $0xa8] sm:$0xff] %v1257_v37 }
  0xf1   : > { %v1262_v38 = vpop.f32.mrf.mxu0  ;;  %v1264_v39 = vpop.f32.mrf.mxu1 }
  0xf2   : > { %628 = vst [vmem:[%s1205_s11 + $0x50] sm:$0xff] %v1262_v38  ;;  %644 = vst [vmem:[%s1205_s11 + $0xd0] sm:$0xff] %v1264_v39 }
  0xf3   : > { %v523_v40 = vpop.f32.mrf.mxu0  ;;  %v1270_v41 = vpop.f32.mrf.mxu1 }
  0xf4   : > { %626 = vst [vmem:[%s1205_s11 + $0x40] sm:$0xff] %v523_v40  ;;  %642 = vst [vmem:[%s1205_s11 + $0xc0] sm:$0xff] %v1270_v41 }
  0xf5   : > { %v996_v42 = vpop.f32.mrf.mxu0  ;;  %v1275_v43 = vpop.f32.mrf.mxu1 }
  0xf6   : > { %629 = vst [vmem:[%s1205_s11 + $0x58] sm:$0xff] %v996_v42  ;;  %645 = vst [vmem:[%s1205_s11 + $0xd8] sm:$0xff] %v1275_v43 }
  0xf7   : > { %v526_v44 = vpop.f32.mrf.mxu0  ;;  %v1280_v45 = vpop.f32.mrf.mxu1 }
  0xf8   : > { %627 = vst [vmem:[%s1205_s11 + $0x48] sm:$0xff] %v526_v44  ;;  %643 = vst [vmem:[%s1205_s11 + $0xc8] sm:$0xff] %v1280_v45 }
  0xf9   : > { %v1285_v46 = vpop.f32.mrf.mxu0  ;;  %v1287_v47 = vpop.f32.mrf.mxu1 }
  0xfa   : > { %632 = vst [vmem:[%s1205_s11 + $0x70] sm:$0xff] %v1285_v46  ;;  %648 = vst [vmem:[%s1205_s11 + $0xf0] sm:$0xff] %v1287_v47 }
  0xfb   : > { %v539_v48 = vpop.f32.mrf.mxu0  ;;  %v1293_v49 = vpop.f32.mrf.mxu1 }
  0xfc   : > { %630 = vst [vmem:[%s1205_s11 + $0x60] sm:$0xff] %v539_v48  ;;  %646 = vst [vmem:[%s1205_s11 + $0xe0] sm:$0xff] %v1293_v49  ;;  %653 = sbr.rel (%p949_p5) target bundleno = 259 (0x103), region = 32 }
  0xfd   : > { %v1000_v50 = vpop.f32.mrf.mxu0  ;;  %v1298_v51 = vpop.f32.mrf.mxu1 }
  0xfe   : > { %633 = vst [vmem:[%s1205_s11 + $0x78] sm:$0xff] %v1000_v50  ;;  %649 = vst [vmem:[%s1205_s11 + $0xf8] sm:$0xff] %v1298_v51 }
  0xff   : > { %v542_v52 = vpop.f32.mrf.mxu0  ;;  %v1303_v53 = vpop.f32.mrf.mxu1 }
 0x100   : > { %631 = vst [vmem:[%s1205_s11 + $0x68] sm:$0xff] %v542_v52  ;;  %647 = vst [vmem:[%s1205_s11 + $0xe8] sm:$0xff] %v1303_v53 }
 0x101   : > { %v1099_v54 = vmov 0.0  }
 0x102   : > { %654 = vst [vmem:[%s1408_s3] sm:$0x1] %v1099_v54  ;;  %655 = vst [vmem:[%s1409_s4] sm:$0x1] %v1099_v54 }
 0x103 PF: > { %v657_v55 = vadd.f32 %v494_v28, %v1215_v24  ;;  %v697_v58 = vmul.f32 %v1215_v24, %v1215_v24  ;;  %v698_v59 = vmul.f32 %v494_v28, %v494_v28  ;;  %v699_v61 = vmul.f32 %v1207_v22, %v1207_v22 }
 0x104   : > { %v700_v63 = vmul.f32 %v1223_v26, %v1223_v26  ;;  %v701_v2 = vmul.f32 %v507_v32, %v507_v32  ;;  %v702_v5 = vmul.f32 %v510_v36, %v510_v36  ;;  %v703_v8 = vmul.f32 %v1236_v30, %v1236_v30 }
 0x105   : > { %v658_v56 = vadd.f32 %v1207_v22, %v657_v55  ;;  %v729_v0 = vadd.f32 %v698_v59, %v697_v58  ;;  %v704_v11 = vmul.f32 %v1249_v34, %v1249_v34  ;;  %v705_v14 = vmul.f32 %v523_v40, %v523_v40 }
 0x106   : > { %v706_v17 = vmul.f32 %v526_v44, %v526_v44  ;;  %v707_v20 = vmul.f32 %v1262_v38, %v1262_v38  ;;  %v708_v24 = vmul.f32 %v996_v42, %v996_v42  ;;  %v713_v58 = vmul.f32 %v1217_v25, %v1217_v25 }
 0x107   : > { %v659_v57 = vadd.f32 %v1223_v26, %v658_v56  ;;  %v730_v3 = vadd.f32 %v729_v0, %v699_v61 }
 0x109   : > { %v660_v60 = vadd.f32 %v659_v57, %v507_v32  ;;  %v731_v6 = vadd.f32 %v730_v3, %v700_v63  ;;  %v716_v63 = vmul.f32 %v1225_v27, %v1225_v27  ;;  %v718_v3 = vmul.f32 %v1257_v37, %v1257_v37 }
 0x10b   : > { %v661_v62 = vadd.f32 %v660_v60, %v510_v36  ;;  %v732_v9 = vadd.f32 %v731_v6, %v701_v2  ;;  %v710_v36 = vmul.f32 %v542_v52, %v542_v52 }
 0x10d   : > { %v662_v1 = vadd.f32 %v1236_v30, %v661_v62  ;;  %v733_v12 = vadd.f32 %v732_v9, %v702_v5  ;;  %v709_v30 = vmul.f32 %v539_v48, %v539_v48  ;;  %v719_v5 = vmul.f32 %v1238_v31, %v1238_v31 }
 0x10e   : > { %v721_v9 = vmul.f32 %v1270_v41, %v1270_v41 }
 0x10f   : > { %v663_v4 = vadd.f32 %v1249_v34, %v662_v1  ;;  %v734_v15 = vadd.f32 %v733_v12, %v703_v8  ;;  %v717_v1 = vmul.f32 %v1244_v33, %v1244_v33 }
 0x111   : > { %v664_v7 = vadd.f32 %v663_v4, %v523_v40  ;;  %v735_v18 = vadd.f32 %v734_v15, %v704_v11  ;;  %v722_v11 = vmul.f32 %v1280_v45, %v1280_v45  ;;  %v724_v15 = vmul.f32 %v1275_v43, %v1275_v43 }
 0x113   : > { %v665_v10 = vadd.f32 %v664_v7, %v526_v44  ;;  %v736_v21 = vadd.f32 %v735_v18, %v705_v14  ;;  %v711_v44 = vmul.f32 %v1285_v46, %v1285_v46  ;;  %v720_v7 = vmul.f32 %v1251_v35, %v1251_v35 }
 0x115   : > { %v666_v13 = vadd.f32 %v1262_v38, %v665_v10  ;;  %v737_v26 = vadd.f32 %v736_v21, %v706_v17  ;;  %v712_v38 = vmul.f32 %v1000_v50, %v1000_v50  ;;  %v725_v17 = vmul.f32 %v1293_v49, %v1293_v49 }
 0x116   : > { %v727_v21 = vmul.f32 %v1287_v47, %v1287_v47 }
 0x117   : > { %v667_v16 = vadd.f32 %v996_v42, %v666_v13  ;;  %v738_v32 = vadd.f32 %v737_v26, %v707_v20  ;;  %v723_v13 = vmul.f32 %v1264_v39, %v1264_v39 }
 0x119   : > { %v668_v19 = vadd.f32 %v667_v16, %v539_v48  ;;  %v739_v54 = vadd.f32 %v738_v32, %v708_v24 }
 0x11b   : > { %v669_v22 = vadd.f32 %v668_v19, %v542_v52  ;;  %v740_v55 = vadd.f32 %v739_v54, %v709_v30  ;;  %v714_v52 = vmul.f32 %v1231_v29, %v1231_v29  ;;  %v726_v19 = vmul.f32 %v1303_v53, %v1303_v53 }
 0x11d   : > { %v670_v28 = vadd.f32 %v1285_v46, %v669_v22  ;;  %v741_v57 = vadd.f32 %v740_v55, %v710_v36  ;;  %v715_v46 = vmul.f32 %v1209_v23, %v1209_v23 }
 0x11f   : > { %v671_v34 = vadd.f32 %v1000_v50, %v670_v28  ;;  %v742_v48 = vadd.f32 %v741_v57, %v711_v44 }
 0x121   : > { %v672_v40 = vadd.f32 %v671_v34, %v1217_v25  ;;  %v743_v60 = vadd.f32 %v742_v48, %v712_v38 }
 0x123   : > { %v673_v56 = vadd.f32 %v672_v40, %v1231_v29  ;;  %v744_v62 = vadd.f32 %v743_v60, %v713_v58 }
 0x125   : > { %v674_v42 = vadd.f32 %v1209_v23, %v673_v56  ;;  %v745_v0 = vadd.f32 %v744_v62, %v714_v52  ;;  %v696_v56 = vld [vmem:[%s1409_s4] sm:$0x1] }
 0x127   : > { %v675_v59 = vadd.f32 %v1225_v27, %v674_v42  ;;  %v746_v2 = vadd.f32 %v745_v0, %v715_v46 }
 0x129   : > { %v676_v61 = vadd.f32 %v675_v59, %v1244_v33  ;;  %v747_v4 = vadd.f32 %v746_v2, %v716_v63 }
 0x12b   : > { %v677_v50 = vadd.f32 %v676_v61, %v1257_v37  ;;  %v748_v6 = vadd.f32 %v747_v4, %v717_v1 }
 0x12d   : > { %v678_v25 = vadd.f32 %v1238_v31, %v677_v50  ;;  %v749_v8 = vadd.f32 %v748_v6, %v718_v3 }
 0x12f   : > { %v679_v29 = vadd.f32 %v1251_v35, %v678_v25  ;;  %v750_v10 = vadd.f32 %v749_v8, %v719_v5 }
 0x131   : > { %v680_v23 = vadd.f32 %v679_v29, %v1270_v41  ;;  %v751_v12 = vadd.f32 %v750_v10, %v720_v7 }
 0x133   : > { %v681_v27 = vadd.f32 %v680_v23, %v1280_v45  ;;  %v752_v14 = vadd.f32 %v751_v12, %v721_v9 }
 0x135   : > { %v682_v33 = vadd.f32 %v1264_v39, %v681_v27  ;;  %v753_v16 = vadd.f32 %v752_v14, %v722_v11 }
 0x137   : > { %v683_v37 = vadd.f32 %v1275_v43, %v682_v33  ;;  %v754_v18 = vadd.f32 %v753_v16, %v723_v13  ;;  %v728_v43 = vmul.f32 %v1298_v51, %v1298_v51 }
 0x139   : > { %v684_v31 = vadd.f32 %v683_v37, %v1293_v49  ;;  %v755_v20 = vadd.f32 %v754_v18, %v724_v15 }
 0x13b   : > { %v685_v35 = vadd.f32 %v684_v31, %v1303_v53  ;;  %v756_v22 = vadd.f32 %v755_v20, %v725_v17  ;;  %v656_v53 = vld [vmem:[%s1408_s3] sm:$0x1] }
 0x13d   : > { %v686_v41 = vadd.f32 %v1287_v47, %v685_v35  ;;  %v757_v26 = vadd.f32 %v756_v22, %v726_v19 }
 0x13f   : > { %v687_v45 = vadd.f32 %v1298_v51, %v686_v41  ;;  %v758_v30 = vadd.f32 %v757_v26, %v727_v21 }
 0x141   : > { %v688_v39 = vrot.slane %v687_v45, 4  ;;  %v759_v32 = vadd.f32 %v758_v30, %v728_v43 }
 0x143   : > { %v689_v24 = vadd.f32 %v688_v39, %v687_v45  ;;  %v760_v36 = vrot.slane %v759_v32, 4 }
 0x145   : > { %v690_v28 = vrot.slane %v689_v24, 2  ;;  %v761_v40 = vadd.f32 %v760_v36, %v759_v32 }
 0x147   : > { %v691_v49 = vadd.f32 %v690_v28, %v689_v24  ;;  %v762_v47 = vrot.slane %v761_v40, 2 }
 0x149   : > { %v692_v34 = vrot.slane %v691_v49, 1  ;;  %v763_v51 = vadd.f32 %v762_v47, %v761_v40 }
 0x14b   : > { %v693_v54 = vadd.f32 %v692_v34, %v691_v49  ;;  %v764_v55 = vrot.slane %v763_v51, 1 }
 0x14d   : > { %v694_v44 = vadd.f32 %v693_v54, %v656_v53  ;;  %v765_v38 = vadd.f32 %v764_v55, %v763_v51 }
 0x14f   : > { %695 = vst [vmem:[%s1408_s3] sm:$0x1] %v694_v44  ;;  %v766_v57 = vadd.f32 %v765_v38, %v696_v56 }
 0x151   : > { %767 = vst [vmem:[%s1409_s4] sm:$0x1] %v766_v57 }
 0x152 PF: > { %s15_s17 = sadd.s32 1, %s1097_s17   ;;  %s1410_s15 = smov %s1093_s16 }
 0x153   : > { %p12_p6 = scmp.ge.s32.totalorder %s15_s17, 4   ;;  %s1411_s16 = smov %s1413_s18 }
 0x155   :  { %14 = sbr.rel (!%p12_p6) target bundleno = 2 (0x2), region = 89 }

// kernel: basic_block_forward.8
= control target key start
LH: loop header
LB: loop body
LE: loop exit
PB: predicated region body
PF: predicated region fallthrough
CT: control target
= control target key end

     0   :  { %s1060_s15 = smov 0   ;;  %s1062_s16 = smov 0   ;;  %s1328_s0 = inlined_call_operand.vmem [shape: bf16[512,4], index: 0, kind: input, shape index: {}]   ;;  %s1329_s1 = inlined_call_operand.vmem [shape: bf16[4,128], index: 1, kind: input, shape index: {}]   ;;  %s1330_s2 = inlined_call_operand.vmem [shape: f32[512,128], index: 2, kind: output, shape index: {0}]   ;;  %s1331_s3 = inlined_call_operand.vmem [shape: f32[1,128], index: 3, kind: output, shape index: {1}]   ;;  %s1332_s4 = inlined_call_operand.vmem [shape: f32[1,128], index: 4, kind: output, shape index: {2}]  }
   0x1   :  { %s1064_s17 = smov 0  }
   0x2 LB: > { %s24_s18 = sadd.s32 1, %s1028_s16  ;;  %p872_p0 = scmp.ge.s32.totalorder %s1032_s17, 1  ;;  %s1032_s17 = sphi %s1064_s17, %s15_s17   ;;  %s1028_s16 = sphi %s1062_s16, %s1334_s16   ;;  %s1024_s15 = sphi %s1060_s15, %s1333_s15  }
   0x3   : > { %p25_p1 = scmp.ge.s32.totalorder %s24_s18, 2  ;;  %p191_p2 = scmp.lt.s32.totalorder %s1032_s17, 3 }
   0x5   : > { %s1336_s18 = smov (%p25_p1, %s24_s18), 0  ;;  %p192_p3 = pnand %p872_p0, %p191_p2 }
   0x6   : > { %s873_s21 = sshll.u32 (!%p192_p3), %s1024_s15, 5  ;;  %p909_p5 = scmp.ne.s32.totalorder (!%p192_p3), %s1024_s15, 0 }
   0x7   : > { %195 = sbr.rel (%p192_p3) target bundleno = 323 (0x143), region = 28  ;;  %p231_p4 = scmp.lt.s32.totalorder (!%p192_p3), %s873_s21, 63 }
   0xc   : > { %v288_v0 = vld [vmem:[%s1329_s1] sm:$0x3]  ;;  %vm418_vm0 = vcmask 1041408   ;;  %s1338_s21 = smov (!%p231_p4, %s873_s21), 63  ;;  %vm369_vm1 = vcmask 31744  }
   0xd   : > { %967 = vmatprep.subr.msk.bf16.mxu0 %vm418_vm0, %v288_v0  ;;  %968 = vmatprep.subr.msk.bf16.mxu1 %vm418_vm0, %v288_v0  ;;  %v420_v1 = vsel %vm418_vm0, %v288_v0, 0  ;;  %s874_s22 = sshll.u32 %s1338_s21, 2  ;;  %s876_s26 = sshll.u32 %s1338_s21, 3 }
   0xe   : > { %932 = vmatpush3.bf16.msra.mxu0 %v420_v1  ;;  %966 = vmatpush3.bf16.msra.mxu1 %v420_v1  ;;  %s1090_s25 = scalar_lea.vmem %s1328_s0, %s874_s22  ;;  %s1128_s29 = scalar_lea.vmem %s1330_s2, %s876_s26 }
   0xf   : > { %v994_v2 = vld [vmem:[%s1090_s25] sm:$0xff]   ;;  %v996_v4 = vld [vmem:[%s1090_s25 + $0x8] sm:$0xff]   ;;  %v998_v6 = vld [vmem:[%s1090_s25 + $0x10] sm:$0xff]  }
  0x10   : > { %v995_v3 = vld [vmem:[%s1090_s25 + $0x40] sm:$0xff]   ;;  %933 = vmatprep.mubr.msk.bf16.mxu0 %vm369_vm1, %v994_v2  ;;  %v997_v5 = vld [vmem:[%s1090_s25 + $0x48] sm:$0xff]   ;;  %v999_v7 = vld [vmem:[%s1090_s25 + $0x50] sm:$0xff]  }
  0x11   : > { %949 = vmatprep.mubr.msk.bf16.mxu1 %vm369_vm1, %v995_v3  ;;  %934 = vmatmul.mubr.msk.bf16.vlgmr.msra.gmra.mxu0 %vm369_vm1, %v996_v4  ;;  %v1000_v8 = vld [vmem:[%s1090_s25 + $0x18] sm:$0xff]   ;;  %v1002_v10 = vld [vmem:[%s1090_s25 + $0x20] sm:$0xff]   ;;  %v1004_v12 = vld [vmem:[%s1090_s25 + $0x28] sm:$0xff]  }
  0x12   : > { %950 = vmatmul.mubr.msk.bf16.vlgmr.msra.gmra.mxu1 %vm369_vm1, %v997_v5  ;;  %937 = vmatprep.mubr.msk.bf16.mxu0 %vm369_vm1, %v998_v6  ;;  %v1001_v9 = vld [vmem:[%s1090_s25 + $0x58] sm:$0xff]   ;;  %v1003_v11 = vld [vmem:[%s1090_s25 + $0x60] sm:$0xff]   ;;  %v1005_v13 = vld [vmem:[%s1090_s25 + $0x68] sm:$0xff]  }
  0x13   : > { %953 = vmatprep.mubr.msk.bf16.mxu1 %vm369_vm1, %v999_v7  ;;  %v1006_v14 = vld [vmem:[%s1090_s25 + $0x30] sm:$0xff]   ;;  %v1008_v16 = vld [vmem:[%s1090_s25 + $0x38] sm:$0xff]  }
  0x14   : > { %v1007_v15 = vld [vmem:[%s1090_s25 + $0x70] sm:$0xff]   ;;  %v1009_v17 = vld [vmem:[%s1090_s25 + $0x78] sm:$0xff]  }
  0x19   : > { %938 = vmatmul.mubr.msk.bf16.gmra.mxu0 %vm369_vm1, %v1000_v8 }
  0x1a   : > { %954 = vmatmul.mubr.msk.bf16.gmra.mxu1 %vm369_vm1, %v1001_v9  ;;  %941 = vmatprep.mubr.msk.bf16.mxu0 %vm369_vm1, %v1002_v10 }
  0x1b   : > { %957 = vmatprep.mubr.msk.bf16.mxu1 %vm369_vm1, %v1003_v11 }
  0x21   : > { %942 = vmatmul.mubr.msk.bf16.gmra.mxu0 %vm369_vm1, %v1004_v12 }
  0x22   : > { %958 = vmatmul.mubr.msk.bf16.gmra.mxu1 %vm369_vm1, %v1005_v13  ;;  %945 = vmatprep.mubr.msk.bf16.mxu0 %vm369_vm1, %v1006_v14 }
  0x23   : > { %961 = vmatprep.mubr.msk.bf16.mxu1 %vm369_vm1, %v1007_v15 }
  0x29   : > { %946 = vmatmul.mubr.msk.bf16.gmra.mxu0 %vm369_vm1, %v1008_v16 }
  0x2a   : > { %962 = vmatmul.mubr.msk.bf16.gmra.mxu1 %vm369_vm1, %v1009_v17 }
  0xd1   : > { %v1130_v18 = vpop.f32.mrf.mxu0 }
  0xd2   : > { %585 = vst [vmem:[%s1128_s29 + $0x10] sm:$0xff] %v1130_v18  ;;  %v1134_v19 = vpop.f32.mrf.mxu1 }
  0xd3   : > { %601 = vst [vmem:[%s1128_s29 + $0x90] sm:$0xff] %v1134_v19  ;;  %v1138_v20 = vpop.f32.mrf.mxu0 }
  0xd4   : > { %583 = vst [vmem:[%s1128_s29] sm:$0xff] %v1138_v20  ;;  %v1142_v21 = vpop.f32.mrf.mxu1 }
  0xd5   : > { %599 = vst [vmem:[%s1128_s29 + $0x80] sm:$0xff] %v1142_v21  ;;  %v1146_v22 = vpop.f32.mrf.mxu0 }
  0xd6   : > { %586 = vst [vmem:[%s1128_s29 + $0x18] sm:$0xff] %v1146_v22  ;;  %v1150_v23 = vpop.f32.mrf.mxu1 }
  0xd7   : > { %602 = vst [vmem:[%s1128_s29 + $0x98] sm:$0xff] %v1150_v23  ;;  %v459_v24 = vpop.f32.mrf.mxu0 }
  0xd8   : > { %584 = vst [vmem:[%s1128_s29 + $0x8] sm:$0xff] %v459_v24  ;;  %v1155_v25 = vpop.f32.mrf.mxu1 }
  0xd9   : > { %600 = vst [vmem:[%s1128_s29 + $0x88] sm:$0xff] %v1155_v25  ;;  %v1159_v26 = vpop.f32.mrf.mxu0 }
  0xda   : > { %589 = vst [vmem:[%s1128_s29 + $0x30] sm:$0xff] %v1159_v26  ;;  %v1163_v27 = vpop.f32.mrf.mxu1 }
  0xdb   : > { %605 = vst [vmem:[%s1128_s29 + $0xb0] sm:$0xff] %v1163_v27  ;;  %v472_v28 = vpop.f32.mrf.mxu0 }
  0xdc   : > { %587 = vst [vmem:[%s1128_s29 + $0x20] sm:$0xff] %v472_v28  ;;  %v1168_v29 = vpop.f32.mrf.mxu1 }
  0xdd   : > { %603 = vst [vmem:[%s1128_s29 + $0xa0] sm:$0xff] %v1168_v29  ;;  %v1172_v30 = vpop.f32.mrf.mxu0 }
  0xde   : > { %590 = vst [vmem:[%s1128_s29 + $0x38] sm:$0xff] %v1172_v30  ;;  %v1176_v31 = vpop.f32.mrf.mxu1 }
  0xdf   : > { %606 = vst [vmem:[%s1128_s29 + $0xb8] sm:$0xff] %v1176_v31  ;;  %v475_v32 = vpop.f32.mrf.mxu0 }
  0xe0   : > { %588 = vst [vmem:[%s1128_s29 + $0x28] sm:$0xff] %v475_v32  ;;  %v1181_v33 = vpop.f32.mrf.mxu1 }
  0xe1   : > { %604 = vst [vmem:[%s1128_s29 + $0xa8] sm:$0xff] %v1181_v33  ;;  %v1185_v34 = vpop.f32.mrf.mxu0 }
  0xe2   : > { %593 = vst [vmem:[%s1128_s29 + $0x50] sm:$0xff] %v1185_v34  ;;  %v1189_v35 = vpop.f32.mrf.mxu1 }
  0xe3   : > { %609 = vst [vmem:[%s1128_s29 + $0xd0] sm:$0xff] %v1189_v35  ;;  %v488_v36 = vpop.f32.mrf.mxu0 }
  0xe4   : > { %591 = vst [vmem:[%s1128_s29 + $0x40] sm:$0xff] %v488_v36  ;;  %v1194_v37 = vpop.f32.mrf.mxu1 }
  0xe5   : > { %607 = vst [vmem:[%s1128_s29 + $0xc0] sm:$0xff] %v1194_v37  ;;  %v944_v38 = vpop.f32.mrf.mxu0 }
  0xe6   : > { %594 = vst [vmem:[%s1128_s29 + $0x58] sm:$0xff] %v944_v38  ;;  %v1199_v39 = vpop.f32.mrf.mxu1 }
  0xe7   : > { %610 = vst [vmem:[%s1128_s29 + $0xd8] sm:$0xff] %v1199_v39  ;;  %v491_v40 = vpop.f32.mrf.mxu0 }
  0xe8   : > { %592 = vst [vmem:[%s1128_s29 + $0x48] sm:$0xff] %v491_v40  ;;  %v1204_v41 = vpop.f32.mrf.mxu1 }
  0xe9   : > { %608 = vst [vmem:[%s1128_s29 + $0xc8] sm:$0xff] %v1204_v41  ;;  %v1208_v42 = vpop.f32.mrf.mxu0 }
  0xea   : > { %597 = vst [vmem:[%s1128_s29 + $0x70] sm:$0xff] %v1208_v42  ;;  %v1212_v43 = vpop.f32.mrf.mxu1 }
  0xeb   : > { %613 = vst [vmem:[%s1128_s29 + $0xf0] sm:$0xff] %v1212_v43  ;;  %v504_v44 = vpop.f32.mrf.mxu0 }
  0xec   : > { %595 = vst [vmem:[%s1128_s29 + $0x60] sm:$0xff] %v504_v44  ;;  %v1217_v45 = vpop.f32.mrf.mxu1 }
  0xed   : > { %611 = vst [vmem:[%s1128_s29 + $0xe0] sm:$0xff] %v1217_v45  ;;  %v948_v46 = vpop.f32.mrf.mxu0  ;;  %618 = sbr.rel (%p909_p5) target bundleno = 244 (0xf4), region = 32 }
  0xee   : > { %598 = vst [vmem:[%s1128_s29 + $0x78] sm:$0xff] %v948_v46  ;;  %v1222_v47 = vpop.f32.mrf.mxu1 }
  0xef   : > { %614 = vst [vmem:[%s1128_s29 + $0xf8] sm:$0xff] %v1222_v47  ;;  %v507_v48 = vpop.f32.mrf.mxu0 }
  0xf0   : > { %596 = vst [vmem:[%s1128_s29 + $0x68] sm:$0xff] %v507_v48  ;;  %v1227_v49 = vpop.f32.mrf.mxu1 }
  0xf1   : > { %612 = vst [vmem:[%s1128_s29 + $0xe8] sm:$0xff] %v1227_v49 }
  0xf2   : > { %v1034_v50 = vmov 0.0  }
  0xf3   : > { %619 = vst [vmem:[%s1331_s3] sm:$0x1] %v1034_v50  ;;  %620 = vst [vmem:[%s1332_s4] sm:$0x1] %v1034_v50 }
  0xf4 PF: > { %v622_v51 = vadd.f32 %v459_v24, %v1138_v20  ;;  %v662_v54 = vmul.f32 %v1138_v20, %v1138_v20  ;;  %v663_v55 = vmul.f32 %v459_v24, %v459_v24  ;;  %v664_v57 = vmul.f32 %v1130_v18, %v1130_v18 }
  0xf5   : > { %v665_v59 = vmul.f32 %v1146_v22, %v1146_v22  ;;  %v666_v62 = vmul.f32 %v472_v28, %v472_v28  ;;  %v667_v1 = vmul.f32 %v475_v32, %v475_v32  ;;  %v668_v4 = vmul.f32 %v1159_v26, %v1159_v26 }
  0xf6   : > { %v623_v52 = vadd.f32 %v1130_v18, %v622_v51  ;;  %v694_v60 = vadd.f32 %v663_v55, %v662_v54  ;;  %v669_v7 = vmul.f32 %v1172_v30, %v1172_v30  ;;  %v670_v10 = vmul.f32 %v488_v36, %v488_v36 }
  0xf7   : > { %v671_v13 = vmul.f32 %v491_v40, %v491_v40  ;;  %v672_v16 = vmul.f32 %v1185_v34, %v1185_v34  ;;  %v673_v20 = vmul.f32 %v944_v38, %v944_v38  ;;  %v678_v54 = vmul.f32 %v1142_v21, %v1142_v21 }
  0xf8   : > { %v624_v53 = vadd.f32 %v1146_v22, %v623_v52  ;;  %v695_v63 = vadd.f32 %v694_v60, %v664_v57 }
  0xfa   : > { %v625_v56 = vadd.f32 %v624_v53, %v472_v28  ;;  %v696_v2 = vadd.f32 %v695_v63, %v665_v59  ;;  %v681_v59 = vmul.f32 %v1150_v23, %v1150_v23  ;;  %v683_v63 = vmul.f32 %v1181_v33, %v1181_v33 }
  0xfc   : > { %v626_v58 = vadd.f32 %v625_v56, %v475_v32  ;;  %v697_v5 = vadd.f32 %v696_v2, %v666_v62  ;;  %v675_v32 = vmul.f32 %v507_v48, %v507_v48 }
  0xfe   : > { %v627_v61 = vadd.f32 %v1159_v26, %v626_v58  ;;  %v698_v8 = vadd.f32 %v697_v5, %v667_v1  ;;  %v674_v26 = vmul.f32 %v504_v44, %v504_v44  ;;  %v684_v1 = vmul.f32 %v1163_v27, %v1163_v27 }
  0xff   : > { %v686_v5 = vmul.f32 %v1194_v37, %v1194_v37 }
 0x100   : > { %v628_v0 = vadd.f32 %v1172_v30, %v627_v61  ;;  %v699_v11 = vadd.f32 %v698_v8, %v668_v4  ;;  %v682_v61 = vmul.f32 %v1168_v29, %v1168_v29 }
 0x102   : > { %v629_v3 = vadd.f32 %v628_v0, %v488_v36  ;;  %v700_v14 = vadd.f32 %v699_v11, %v669_v7  ;;  %v687_v7 = vmul.f32 %v1204_v41, %v1204_v41  ;;  %v689_v11 = vmul.f32 %v1199_v39, %v1199_v39 }
 0x104   : > { %v630_v6 = vadd.f32 %v629_v3, %v491_v40  ;;  %v701_v17 = vadd.f32 %v700_v14, %v670_v10  ;;  %v676_v40 = vmul.f32 %v1208_v42, %v1208_v42  ;;  %v685_v3 = vmul.f32 %v1176_v31, %v1176_v31 }
 0x106   : > { %v631_v9 = vadd.f32 %v1185_v34, %v630_v6  ;;  %v702_v22 = vadd.f32 %v701_v17, %v671_v13  ;;  %v677_v34 = vmul.f32 %v948_v46, %v948_v46  ;;  %v690_v13 = vmul.f32 %v1217_v45, %v1217_v45 }
 0x107   : > { %v692_v17 = vmul.f32 %v1212_v43, %v1212_v43 }
 0x108   : > { %v632_v12 = vadd.f32 %v944_v38, %v631_v9  ;;  %v703_v28 = vadd.f32 %v702_v22, %v672_v16  ;;  %v688_v9 = vmul.f32 %v1189_v35, %v1189_v35 }
 0x10a   : > { %v633_v15 = vadd.f32 %v632_v12, %v504_v44  ;;  %v704_v50 = vadd.f32 %v703_v28, %v673_v20 }
 0x10c   : > { %v634_v18 = vadd.f32 %v633_v15, %v507_v48  ;;  %v705_v51 = vadd.f32 %v704_v50, %v674_v26  ;;  %v679_v48 = vmul.f32 %v1155_v25, %v1155_v25  ;;  %v691_v15 = vmul.f32 %v1227_v49, %v1227_v49 }
 0x10e   : > { %v635_v24 = vadd.f32 %v1208_v42, %v634_v18  ;;  %v706_v53 = vadd.f32 %v705_v51, %v675_v32  ;;  %v680_v42 = vmul.f32 %v1134_v19, %v1134_v19 }
 0x110   : > { %v636_v30 = vadd.f32 %v948_v46, %v635_v24  ;;  %v707_v44 = vadd.f32 %v706_v53, %v676_v40 }
 0x112   : > { %v637_v36 = vadd.f32 %v636_v30, %v1142_v21  ;;  %v708_v56 = vadd.f32 %v707_v44, %v677_v34 }
 0x114   : > { %v638_v52 = vadd.f32 %v637_v36, %v1155_v25  ;;  %v709_v58 = vadd.f32 %v708_v56, %v678_v54 }
 0x116   : > { %v639_v38 = vadd.f32 %v1134_v19, %v638_v52  ;;  %v710_v60 = vadd.f32 %v709_v58, %v679_v48  ;;  %v661_v52 = vld [vmem:[%s1332_s4] sm:$0x1] }
 0x118   : > { %v640_v55 = vadd.f32 %v1150_v23, %v639_v38  ;;  %v711_v62 = vadd.f32 %v710_v60, %v680_v42 }
 0x11a   : > { %v641_v57 = vadd.f32 %v640_v55, %v1168_v29  ;;  %v712_v0 = vadd.f32 %v711_v62, %v681_v59 }
 0x11c   : > { %v642_v46 = vadd.f32 %v641_v57, %v1181_v33  ;;  %v713_v2 = vadd.f32 %v712_v0, %v682_v61 }
 0x11e   : > { %v643_v21 = vadd.f32 %v1163_v27, %v642_v46  ;;  %v714_v4 = vadd.f32 %v713_v2, %v683_v63 }
 0x120   : > { %v644_v25 = vadd.f32 %v1176_v31, %v643_v21  ;;  %v715_v6 = vadd.f32 %v714_v4, %v684_v1 }
 0x122   : > { %v645_v19 = vadd.f32 %v644_v25, %v1194_v37  ;;  %v716_v8 = vadd.f32 %v715_v6, %v685_v3 }
 0x124   : > { %v646_v23 = vadd.f32 %v645_v19, %v1204_v41  ;;  %v717_v10 = vadd.f32 %v716_v8, %v686_v5 }
 0x126   : > { %v647_v29 = vadd.f32 %v1189_v35, %v646_v23  ;;  %v718_v12 = vadd.f32 %v717_v10, %v687_v7 }
 0x128   : > { %v648_v33 = vadd.f32 %v1199_v39, %v647_v29  ;;  %v719_v14 = vadd.f32 %v718_v12, %v688_v9  ;;  %v693_v39 = vmul.f32 %v1222_v47, %v1222_v47 }
 0x12a   : > { %v649_v27 = vadd.f32 %v648_v33, %v1217_v45  ;;  %v720_v16 = vadd.f32 %v719_v14, %v689_v11 }
 0x12c   : > { %v650_v31 = vadd.f32 %v649_v27, %v1227_v49  ;;  %v721_v18 = vadd.f32 %v720_v16, %v690_v13  ;;  %v621_v49 = vld [vmem:[%s1331_s3] sm:$0x1] }
 0x12e   : > { %v651_v37 = vadd.f32 %v1212_v43, %v650_v31  ;;  %v722_v22 = vadd.f32 %v721_v18, %v691_v15 }
 0x130   : > { %v652_v41 = vadd.f32 %v1222_v47, %v651_v37  ;;  %v723_v26 = vadd.f32 %v722_v22, %v692_v17 }
 0x132   : > { %v653_v35 = vrot.slane %v652_v41, 4  ;;  %v724_v28 = vadd.f32 %v723_v26, %v693_v39 }
 0x134   : > { %v654_v20 = vadd.f32 %v653_v35, %v652_v41  ;;  %v725_v32 = vrot.slane %v724_v28, 4 }
 0x136   : > { %v655_v24 = vrot.slane %v654_v20, 2  ;;  %v726_v36 = vadd.f32 %v725_v32, %v724_v28 }
 0x138   : > { %v656_v45 = vadd.f32 %v655_v24, %v654_v20  ;;  %v727_v43 = vrot.slane %v726_v36, 2 }
 0x13a   : > { %v657_v30 = vrot.slane %v656_v45, 1  ;;  %v728_v47 = vadd.f32 %v727_v43, %v726_v36 }
 0x13c   : > { %v658_v50 = vadd.f32 %v657_v30, %v656_v45  ;;  %v729_v51 = vrot.slane %v728_v47, 1 }
 0x13e   : > { %v659_v40 = vadd.f32 %v658_v50, %v621_v49  ;;  %v730_v34 = vadd.f32 %v729_v51, %v728_v47 }
 0x140   : > { %660 = vst [vmem:[%s1331_s3] sm:$0x1] %v659_v40  ;;  %v731_v53 = vadd.f32 %v730_v34, %v661_v52 }
 0x142   : > { %732 = vst [vmem:[%s1332_s4] sm:$0x1] %v731_v53 }
 0x143 PF: > { %s15_s17 = sadd.s32 1, %s1032_s17   ;;  %s1333_s15 = smov %s1028_s16 }
 0x144   : > { %p12_p6 = scmp.ge.s32.totalorder %s15_s17, 4   ;;  %s1334_s16 = smov %s1336_s18 }
 0x146   :  { %14 = sbr.rel (!%p12_p6) target bundleno = 2 (0x2), region = 89 }

// kernel: basic_block_forward.9
= control target key start
LH: loop header
LB: loop body
LE: loop exit
PB: predicated region body
PF: predicated region fallthrough
CT: control target
= control target key end

     0   :  { %s726_s18 = smov 0   ;;  %s728_s19 = smov 0   ;;  %s1095_s0 = inlined_call_operand.vmem [shape: f32[512,128], index: 0, kind: input, shape index: {}]   ;;  %s1096_s1 = inlined_call_operand.vmem [shape: f32[1,128], index: 1, kind: input, shape index: {}]   ;;  %s1097_s2 = inlined_call_operand.vmem [shape: f32[1,128], index: 2, kind: input, shape index: {}]   ;;  %s1098_s3 = inlined_call_operand.vmem [shape: f32[1,128], index: 3, kind: input, shape index: {}]   ;;  %s1099_s4 = inlined_call_operand.vmem [shape: f32[1,128], index: 4, kind: input, shape index: {}]   ;;  %s1100_s5 = inlined_call_operand.vmem [shape: f32[512,128], index: 5, kind: output, shape index: {}]  }
   0x1   :  { %s730_s20 = smov 0  }
   0x2 LB: > { %s24_s21 = sadd.s32 1, %s690_s19  ;;  %p638_p0 = scmp.ge.s32.totalorder %s694_s20, 1  ;;  %s694_s20 = sphi %s730_s20, %s15_s20   ;;  %s690_s19 = sphi %s728_s19, %s1102_s19   ;;  %s686_s18 = sphi %s726_s18, %s1101_s18  }
   0x3   : > { %p25_p1 = scmp.ge.s32.totalorder %s24_s21, 2  ;;  %p239_p2 = scmp.lt.s32.totalorder %s694_s20, 3 }
   0x5   : > { %s1104_s21 = smov (%p25_p1, %s24_s21), 0  ;;  %p240_p3 = pnand %p638_p0, %p239_p2 }
   0x6   : > { %s639_s22 = sshll.u32 (!%p240_p3), %s686_s18, 5 }
   0x7   : > { %243 = sbr.rel (%p240_p3) target bundleno = 61 (0x3d), region = 40  ;;  %p286_p4 = scmp.lt.s32.totalorder (!%p240_p3), %s639_s22, 63 }
   0xc   : > { %v347_v0 = vld [vmem:[%s1096_s1] sm:$0x1]  ;;  %v358_v4 = vlaneseq  ;;  %s1106_s22 = smov (!%p286_p4, %s639_s22), 63 }
   0xd   : > { %v349_v1 = vld [vmem:[%s1097_s2] sm:$0x1]  ;;  %v348_v2 = vmul.f32 0.001953125, %v347_v0  ;;  %s640_s27 = sshll.u32 %s1106_s22, 3 }
   0xe   : > { %v350_v3 = vmul.f32 0.001953125, %v349_v1  ;;  %v752_v7 = vshrl.u32 %v358_v4, 7  ;;  %s760_s30 = scalar_lea.vmem %s1095_s0, %s640_s27  ;;  %v353_v25 = vld [vmem:[%s1098_s3] sm:$0x1]  ;;  %s944_s12 = scalar_lea.vmem %s1100_s5, %s640_s27 }
   0xf   : > { %v351_v5 = vmul.f32 %v348_v2, %v348_v2  ;;  %v764_v10 = vld [vmem:[%s760_s30] sm:$0xff]  ;;  %v767_v11 = vld [vmem:[%s760_s30 + $0x8] sm:$0xff]  ;;  %v772_v13 = vld [vmem:[%s760_s30 + $0x10] sm:$0xff] }
  0x10   : > { %v360_v9 = vsub.s32 0, %v752_v7  ;;  %v775_v14 = vld [vmem:[%s760_s30 + $0x18] sm:$0xff]  ;;  %v778_v15 = vld [vmem:[%s760_s30 + $0x20] sm:$0xff]  ;;  %v781_v16 = vld [vmem:[%s760_s30 + $0x28] sm:$0xff] }
  0x11   : > { %v352_v6 = vsub.f32 %v350_v3, %v351_v5  ;;  %v784_v17 = vld [vmem:[%s760_s30 + $0x30] sm:$0xff]  ;;  %v787_v18 = vld [vmem:[%s760_s30 + $0x38] sm:$0xff]  ;;  %v790_v19 = vld [vmem:[%s760_s30 + $0x40] sm:$0xff] }
  0x12   : > { %v769_v12 = vrot.slane %v348_v2, %v360_v9  ;;  %v793_v20 = vld [vmem:[%s760_s30 + $0x48] sm:$0xff]  ;;  %v796_v21 = vld [vmem:[%s760_s30 + $0x50] sm:$0xff]  ;;  %v799_v22 = vld [vmem:[%s760_s30 + $0x58] sm:$0xff] }
  0x13   : > { %v354_v8 = vadd.f32 1e-05, %v352_v6  ;;  %v802_v23 = vld [vmem:[%s760_s30 + $0x60] sm:$0xff]  ;;  %v805_v24 = vld [vmem:[%s760_s30 + $0x68] sm:$0xff]  ;;  %v815_v28 = vld [vmem:[%s760_s30 + $0x70] sm:$0xff] }
  0x14   : > { %v363_v26 = vsub.f32 %v764_v10, %v769_v12  ;;  %v364_v27 = vsub.f32 %v767_v11, %v769_v12  ;;  %v818_v29 = vld [vmem:[%s760_s30 + $0x78] sm:$0xff]  ;;  %v821_v30 = vld [vmem:[%s760_s30 + $0x80] sm:$0xff]  ;;  %v365_v31 = vsub.f32 %v772_v13, %v769_v12  ;;  %v366_v32 = vsub.f32 %v775_v14, %v769_v12  ;;  %v832_v35 = vld [vmem:[%s760_s30 + $0x88] sm:$0xff] }
  0x15   : > { %670 = vrsqrt.f32 %v354_v8  ;;  %v367_v33 = vsub.f32 %v778_v15, %v769_v12  ;;  %v368_v34 = vsub.f32 %v781_v16, %v769_v12  ;;  %v835_v36 = vld [vmem:[%s760_s30 + $0x90] sm:$0xff]  ;;  %v838_v37 = vld [vmem:[%s760_s30 + $0x98] sm:$0xff]  ;;  %v369_v38 = vsub.f32 %v784_v17, %v769_v12  ;;  %v849_v42 = vld [vmem:[%s760_s30 + $0xa0] sm:$0xff] }
  0x16   : > { %v370_v39 = vsub.f32 %v787_v18, %v769_v12  ;;  %v371_v40 = vsub.f32 %v790_v19, %v769_v12  ;;  %v372_v41 = vsub.f32 %v793_v20, %v769_v12  ;;  %v852_v43 = vld [vmem:[%s760_s30 + $0xa8] sm:$0xff]  ;;  %v855_v44 = vld [vmem:[%s760_s30 + $0xb0] sm:$0xff]  ;;  %v373_v45 = vsub.f32 %v796_v21, %v769_v12  ;;  %v866_v49 = vld [vmem:[%s760_s30 + $0xb8] sm:$0xff] }
  0x17   : > { %v374_v46 = vsub.f32 %v799_v22, %v769_v12  ;;  %v375_v47 = vsub.f32 %v802_v23, %v769_v12  ;;  %v376_v48 = vsub.f32 %v805_v24, %v769_v12  ;;  %v869_v50 = vld [vmem:[%s760_s30 + $0xc0] sm:$0xff]  ;;  %v872_v51 = vld [vmem:[%s760_s30 + $0xc8] sm:$0xff]  ;;  %v377_v53 = vsub.f32 %v815_v28, %v769_v12  ;;  %v883_v57 = vld [vmem:[%s760_s30 + $0xd0] sm:$0xff] }
  0x18   : > { %v378_v54 = vsub.f32 %v818_v29, %v769_v12  ;;  %v379_v55 = vsub.f32 %v821_v30, %v769_v12  ;;  %v380_v56 = vsub.f32 %v832_v35, %v769_v12  ;;  %v886_v58 = vld [vmem:[%s760_s30 + $0xd8] sm:$0xff]  ;;  %v889_v59 = vld [vmem:[%s760_s30 + $0xe0] sm:$0xff]  ;;  %v381_v61 = vsub.f32 %v835_v36, %v769_v12  ;;  %v898_v0 = vld [vmem:[%s760_s30 + $0xe8] sm:$0xff] }
  0x19   : > { %v382_v62 = vsub.f32 %v838_v37, %v769_v12  ;;  %v383_v63 = vsub.f32 %v849_v42, %v769_v12  ;;  %v901_v1 = vld [vmem:[%s760_s30 + $0xf0] sm:$0xff]  ;;  %v904_v2 = vld [vmem:[%s760_s30 + $0xf8] sm:$0xff]  ;;  %v384_v3 = vsub.f32 %v852_v43, %v769_v12  ;;  %v385_v4 = vsub.f32 %v855_v44, %v769_v12  ;;  %v925_v13 = vld [vmem:[%s1099_s4] ss:$0 sm:$0xff] }
  0x1a   : > { %v386_v5 = vsub.f32 %v866_v49, %v769_v12  ;;  %v387_v6 = vsub.f32 %v869_v50, %v769_v12  ;;  %v388_v8 = vsub.f32 %v872_v51, %v769_v12  ;;  %v389_v10 = vsub.f32 %v883_v57, %v769_v12 }
  0x1b   : > { %v390_v11 = vsub.f32 %v886_v58, %v769_v12  ;;  %v391_v14 = vsub.f32 %v889_v59, %v769_v12  ;;  %v393_v15 = vsub.f32 %v901_v1, %v769_v12  ;;  %v394_v16 = vsub.f32 %v904_v2, %v769_v12 }
  0x22   : > { %v671_v52 = vpop.eup %670 }
  0x23   : > { %v356_v60 = vmul.f32 %v671_v52, %v353_v25 }
  0x25   : > { %v914_v7 = vrot.slane %v356_v60, %v360_v9  ;;  %v392_v9 = vsub.f32 %v898_v0, %v769_v12 }
  0x27   : > { %v401_v17 = vmul.f32 %v914_v7, %v363_v26  ;;  %v402_v18 = vmul.f32 %v914_v7, %v364_v27  ;;  %v403_v19 = vmul.f32 %v914_v7, %v365_v31  ;;  %v404_v20 = vmul.f32 %v914_v7, %v366_v32 }
  0x28   : > { %v405_v21 = vmul.f32 %v914_v7, %v367_v33  ;;  %v406_v22 = vmul.f32 %v914_v7, %v368_v34  ;;  %v407_v23 = vmul.f32 %v914_v7, %v369_v38  ;;  %v408_v24 = vmul.f32 %v914_v7, %v370_v39 }
  0x29   : > { %v440_v25 = vadd.f32 %v925_v13, %v401_v17  ;;  %v441_v26 = vadd.f32 %v925_v13, %v402_v18  ;;  %v442_v27 = vadd.f32 %v925_v13, %v403_v19  ;;  %v443_v28 = vadd.f32 %v925_v13, %v404_v20 }
  0x2a   : > { %v444_v29 = vadd.f32 %v925_v13, %v405_v21  ;;  %v445_v31 = vadd.f32 %v925_v13, %v406_v22  ;;  %v446_v32 = vadd.f32 %v925_v13, %v407_v23  ;;  %v447_v33 = vadd.f32 %v925_v13, %v408_v24 }
  0x2b   : > { %472 = vst [vmem:[%s944_s12] sm:$0xff] %v440_v25  ;;  %473 = vst [vmem:[%s944_s12 + $0x8] sm:$0xff] %v441_v26  ;;  %v409_v34 = vmul.f32 %v914_v7, %v371_v40  ;;  %v410_v38 = vmul.f32 %v914_v7, %v372_v41  ;;  %v411_v39 = vmul.f32 %v914_v7, %v373_v45 }
  0x2c   : > { %474 = vst [vmem:[%s944_s12 + $0x10] sm:$0xff] %v442_v27  ;;  %475 = vst [vmem:[%s944_s12 + $0x18] sm:$0xff] %v443_v28  ;;  %v412_v52 = vmul.f32 %v914_v7, %v374_v46  ;;  %v413_v60 = vmul.f32 %v914_v7, %v375_v47  ;;  %v414_v17 = vmul.f32 %v914_v7, %v376_v48 }
  0x2d   : > { %476 = vst [vmem:[%s944_s12 + $0x20] sm:$0xff] %v444_v29  ;;  %477 = vst [vmem:[%s944_s12 + $0x28] sm:$0xff] %v445_v31  ;;  %v415_v40 = vmul.f32 %v914_v7, %v377_v53  ;;  %v416_v41 = vmul.f32 %v914_v7, %v378_v54  ;;  %v448_v45 = vadd.f32 %v925_v13, %v409_v34 }
  0x2e   : > { %478 = vst [vmem:[%s944_s12 + $0x30] sm:$0xff] %v446_v32  ;;  %479 = vst [vmem:[%s944_s12 + $0x38] sm:$0xff] %v447_v33  ;;  %v449_v46 = vadd.f32 %v925_v13, %v410_v38  ;;  %v450_v18 = vadd.f32 %v925_v13, %v411_v39  ;;  %v451_v19 = vadd.f32 %v925_v13, %v412_v52 }
  0x2f   : > { %v452_v47 = vadd.f32 %v925_v13, %v413_v60  ;;  %v453_v48 = vadd.f32 %v925_v13, %v414_v17  ;;  %v454_v53 = vadd.f32 %v925_v13, %v415_v40  ;;  %v455_v54 = vadd.f32 %v925_v13, %v416_v41  ;;  %480 = vst [vmem:[%s944_s12 + $0x40] sm:$0xff] %v448_v45 }
  0x30   : > { %481 = vst [vmem:[%s944_s12 + $0x48] sm:$0xff] %v449_v46  ;;  %482 = vst [vmem:[%s944_s12 + $0x50] sm:$0xff] %v450_v18  ;;  %v417_v20 = vmul.f32 %v914_v7, %v379_v55  ;;  %v418_v21 = vmul.f32 %v914_v7, %v380_v56  ;;  %v419_v22 = vmul.f32 %v914_v7, %v381_v61 }
  0x31   : > { %483 = vst [vmem:[%s944_s12 + $0x58] sm:$0xff] %v451_v19  ;;  %v420_v23 = vmul.f32 %v914_v7, %v382_v62  ;;  %484 = vst [vmem:[%s944_s12 + $0x60] sm:$0xff] %v452_v47  ;;  %v421_v30 = vmul.f32 %v914_v7, %v383_v63  ;;  %v422_v35 = vmul.f32 %v914_v7, %v384_v3 }
  0x32   : > { %485 = vst [vmem:[%s944_s12 + $0x68] sm:$0xff] %v453_v48  ;;  %486 = vst [vmem:[%s944_s12 + $0x70] sm:$0xff] %v454_v53  ;;  %v423_v36 = vmul.f32 %v914_v7, %v385_v4  ;;  %v424_v37 = vmul.f32 %v914_v7, %v386_v5  ;;  %v456_v42 = vadd.f32 %v925_v13, %v417_v20 }
  0x33   : > { %487 = vst [vmem:[%s944_s12 + $0x78] sm:$0xff] %v455_v54  ;;  %v457_v55 = vadd.f32 %v925_v13, %v418_v21  ;;  %v458_v43 = vadd.f32 %v925_v13, %v419_v22  ;;  %v459_v56 = vadd.f32 %v925_v13, %v420_v23  ;;  %v460_v44 = vadd.f32 %v925_v13, %v421_v30 }
  0x34   : > { %v461_v61 = vadd.f32 %v925_v13, %v422_v35  ;;  %v462_v49 = vadd.f32 %v925_v13, %v423_v36  ;;  %v463_v62 = vadd.f32 %v925_v13, %v424_v37  ;;  %488 = vst [vmem:[%s944_s12 + $0x80] sm:$0xff] %v456_v42  ;;  %v425_v63 = vmul.f32 %v914_v7, %v387_v6 }
  0x35   : > { %489 = vst [vmem:[%s944_s12 + $0x88] sm:$0xff] %v457_v55  ;;  %490 = vst [vmem:[%s944_s12 + $0x90] sm:$0xff] %v458_v43  ;;  %v426_v3 = vmul.f32 %v914_v7, %v388_v8  ;;  %v427_v4 = vmul.f32 %v914_v7, %v389_v10  ;;  %v428_v5 = vmul.f32 %v914_v7, %v390_v11 }
  0x36   : > { %491 = vst [vmem:[%s944_s12 + $0x98] sm:$0xff] %v459_v56  ;;  %492 = vst [vmem:[%s944_s12 + $0xa0] sm:$0xff] %v460_v44  ;;  %v429_v50 = vmul.f32 %v914_v7, %v391_v14  ;;  %v430_v51 = vmul.f32 %v914_v7, %v392_v9  ;;  %v431_v57 = vmul.f32 %v914_v7, %v393_v15 }
  0x37   : > { %493 = vst [vmem:[%s944_s12 + $0xa8] sm:$0xff] %v461_v61  ;;  %494 = vst [vmem:[%s944_s12 + $0xb0] sm:$0xff] %v462_v49  ;;  %v432_v58 = vmul.f32 %v914_v7, %v394_v16  ;;  %v464_v59 = vadd.f32 %v925_v13, %v425_v63  ;;  %v465_v0 = vadd.f32 %v925_v13, %v426_v3 }
  0x38   : > { %495 = vst [vmem:[%s944_s12 + $0xb8] sm:$0xff] %v463_v62  ;;  %v466_v6 = vadd.f32 %v925_v13, %v427_v4  ;;  %v467_v8 = vadd.f32 %v925_v13, %v428_v5  ;;  %v468_v1 = vadd.f32 %v925_v13, %v429_v50  ;;  %v469_v10 = vadd.f32 %v925_v13, %v430_v51 }
  0x39   : > { %v470_v11 = vadd.f32 %v925_v13, %v431_v57  ;;  %v471_v12 = vadd.f32 %v925_v13, %v432_v58  ;;  %496 = vst [vmem:[%s944_s12 + $0xc0] sm:$0xff] %v464_v59  ;;  %497 = vst [vmem:[%s944_s12 + $0xc8] sm:$0xff] %v465_v0 }
  0x3a   : > { %498 = vst [vmem:[%s944_s12 + $0xd0] sm:$0xff] %v466_v6  ;;  %499 = vst [vmem:[%s944_s12 + $0xd8] sm:$0xff] %v467_v8 }
  0x3b   : > { %500 = vst [vmem:[%s944_s12 + $0xe0] sm:$0xff] %v468_v1  ;;  %501 = vst [vmem:[%s944_s12 + $0xe8] sm:$0xff] %v469_v10 }
  0x3c   : > { %502 = vst [vmem:[%s944_s12 + $0xf0] sm:$0xff] %v470_v11  ;;  %503 = vst [vmem:[%s944_s12 + $0xf8] sm:$0xff] %v471_v12 }
  0x3d PF: > { %s15_s20 = sadd.s32 1, %s694_s20   ;;  %s1101_s18 = smov %s690_s19 }
  0x3e   : > { %p12_p5 = scmp.ge.s32.totalorder %s15_s20, 4   ;;  %s1102_s19 = smov %s1104_s21 }
  0x40   :  { %14 = sbr.rel (!%p12_p5) target bundleno = 2 (0x2), region = 82 }

// kernel: basic_block_forward.11
= control target key start
LH: loop header
LB: loop body
LE: loop exit
PB: predicated region body
PF: predicated region fallthrough
CT: control target
= control target key end

     0   :  { %s904_s21 = smov 0   ;;  %s906_s22 = smov 0   ;;  %s1311_s0 = inlined_call_operand.vmem [shape: f32[512,128], index: 0, kind: input, shape index: {}]   ;;  %s1312_s1 = inlined_call_operand.vmem [shape: f32[1,128], index: 1, kind: input, shape index: {}]   ;;  %s1313_s2 = inlined_call_operand.vmem [shape: f32[1,128], index: 2, kind: input, shape index: {}]   ;;  %s1314_s3 = inlined_call_operand.vmem [shape: f32[1,128], index: 3, kind: input, shape index: {}]   ;;  %s1315_s4 = inlined_call_operand.vmem [shape: f32[1,128], index: 4, kind: input, shape index: {}]   ;;  %s1316_s5 = inlined_call_operand.vmem [shape: f32[512,128], index: 5, kind: input, shape index: {}]   ;;  %s1317_s6 = inlined_call_operand.vmem [shape: f32[512,128], index: 6, kind: output, shape index: {}]  }
   0x1   :  { %s908_s23 = smov 0  }
   0x2 LB: > { %s25_s24 = sadd.s32 1, %s863_s22  ;;  %p809_p0 = scmp.ge.s32.totalorder %s867_s23, 1  ;;  %s867_s23 = sphi %s908_s23, %s16_s23   ;;  %s863_s22 = sphi %s906_s22, %s1327_s22   ;;  %s859_s21 = sphi %s904_s21, %s1326_s21  }
   0x3   : > { %p26_p1 = scmp.ge.s32.totalorder %s25_s24, 2  ;;  %p280_p2 = scmp.lt.s32.totalorder %s867_s23, 3 }
   0x5   : > { %s1329_s24 = smov (%p26_p1, %s25_s24), 0  ;;  %p281_p3 = pnand %p809_p0, %p280_p2 }
   0x6   : > { %s810_s25 = sshll.u32 (!%p281_p3), %s859_s21, 5 }
   0x7   : > { %284 = sbr.rel (%p281_p3) target bundleno = 80 (0x50), region = 44  ;;  %p337_p4 = scmp.lt.s32.totalorder (!%p281_p3), %s810_s25, 63 }
   0xc   : > { %v407_v0 = vld [vmem:[%s1312_s1] sm:$0x1]  ;;  %v418_v5 = vlaneseq  ;;  %s1331_s25 = smov (!%p337_p4, %s810_s25), 63 }
   0xd   : > { %v409_v1 = vld [vmem:[%s1313_s2] sm:$0x1]  ;;  %v408_v2 = vmul.f32 0.001953125, %v407_v0  ;;  %s928_s30 = sshll.u32 %s1331_s25, 3 }
   0xe   : > { %v410_v3 = vmul.f32 0.001953125, %v409_v1  ;;  %v419_v8 = vshrl.u32 %v418_v5, 7  ;;  %s934_s9 = scalar_lea.vmem %s1311_s0, %s928_s30  ;;  %v413_v21 = vld [vmem:[%s1314_s3] sm:$0x1]  ;;  %s1059_s14 = scalar_lea.vmem %s1316_s5, %s928_s30 }
   0xf   : > { %v411_v4 = vmul.f32 %v408_v2, %v408_v2  ;;  %v937_v10 = vld [vmem:[%s934_s9] sm:$0xff]  ;;  %v942_v12 = vld [vmem:[%s934_s9 + $0x8] sm:$0xff]  ;;  %v945_v13 = vld [vmem:[%s934_s9 + $0x10] sm:$0xff]  ;;  %s1127_s19 = scalar_lea.vmem %s1317_s6, %s928_s30 }
  0x10   : > { %v420_v9 = vsub.s32 0, %v419_v8  ;;  %v948_v14 = vld [vmem:[%s934_s9 + $0x18] sm:$0xff]  ;;  %v951_v15 = vld [vmem:[%s934_s9 + $0x20] sm:$0xff]  ;;  %v954_v16 = vld [vmem:[%s934_s9 + $0x28] sm:$0xff] }
  0x11   : > { %v412_v6 = vsub.f32 %v410_v3, %v411_v4  ;;  %v957_v17 = vld [vmem:[%s934_s9 + $0x30] sm:$0xff]  ;;  %v960_v18 = vld [vmem:[%s934_s9 + $0x38] sm:$0xff]  ;;  %v963_v19 = vld [vmem:[%s934_s9 + $0x40] sm:$0xff] }
  0x12   : > { %v939_v11 = vrot.slane %v408_v2, %v420_v9  ;;  %v966_v20 = vld [vmem:[%s934_s9 + $0x48] sm:$0xff]  ;;  %v972_v22 = vld [vmem:[%s934_s9 + $0x50] sm:$0xff]  ;;  %v975_v23 = vld [vmem:[%s934_s9 + $0x58] sm:$0xff] }
  0x13   : > { %v414_v7 = vadd.f32 1e-05, %v412_v6  ;;  %v978_v24 = vld [vmem:[%s934_s9 + $0x60] sm:$0xff]  ;;  %v987_v28 = vld [vmem:[%s934_s9 + $0x68] sm:$0xff]  ;;  %v990_v29 = vld [vmem:[%s934_s9 + $0x70] sm:$0xff] }
  0x14   : > { %v423_v25 = vsub.f32 %v937_v10, %v939_v11  ;;  %v424_v26 = vsub.f32 %v942_v12, %v939_v11  ;;  %v425_v27 = vsub.f32 %v945_v13, %v939_v11  ;;  %v993_v30 = vld [vmem:[%s934_s9 + $0x78] sm:$0xff]  ;;  %v426_v31 = vsub.f32 %v948_v14, %v939_v11  ;;  %v1004_v35 = vld [vmem:[%s934_s9 + $0x80] sm:$0xff]  ;;  %v1007_v36 = vld [vmem:[%s934_s9 + $0x88] sm:$0xff] }
  0x15   : > { %843 = vrsqrt.f32 %v414_v7  ;;  %v427_v32 = vsub.f32 %v951_v15, %v939_v11  ;;  %v428_v33 = vsub.f32 %v954_v16, %v939_v11  ;;  %v429_v34 = vsub.f32 %v957_v17, %v939_v11  ;;  %v1010_v37 = vld [vmem:[%s934_s9 + $0x90] sm:$0xff]  ;;  %v1021_v42 = vld [vmem:[%s934_s9 + $0x98] sm:$0xff]  ;;  %v1024_v43 = vld [vmem:[%s934_s9 + $0xa0] sm:$0xff] }
  0x16   : > { %v430_v38 = vsub.f32 %v960_v18, %v939_v11  ;;  %v431_v39 = vsub.f32 %v963_v19, %v939_v11  ;;  %v432_v40 = vsub.f32 %v966_v20, %v939_v11  ;;  %v433_v41 = vsub.f32 %v972_v22, %v939_v11  ;;  %v1027_v44 = vld [vmem:[%s934_s9 + $0xa8] sm:$0xff]  ;;  %v1038_v50 = vld [vmem:[%s934_s9 + $0xb0] sm:$0xff]  ;;  %v1041_v51 = vld [vmem:[%s934_s9 + $0xb8] sm:$0xff] }
  0x17   : > { %v434_v46 = vsub.f32 %v975_v23, %v939_v11  ;;  %v435_v47 = vsub.f32 %v978_v24, %v939_v11  ;;  %v436_v48 = vsub.f32 %v987_v28, %v939_v11  ;;  %v437_v49 = vsub.f32 %v990_v29, %v939_v11  ;;  %v1050_v56 = vld [vmem:[%s934_s9 + $0xc0] sm:$0xff]  ;;  %v1053_v57 = vld [vmem:[%s934_s9 + $0xc8] sm:$0xff]  ;;  %v1070_v62 = vld [vmem:[%s934_s9 + $0xd0] sm:$0xff] }
  0x18   : > { %v438_v53 = vsub.f32 %v993_v30, %v939_v11  ;;  %v439_v54 = vsub.f32 %v1004_v35, %v939_v11  ;;  %v440_v55 = vsub.f32 %v1007_v36, %v939_v11  ;;  %v441_v58 = vsub.f32 %v1010_v37, %v939_v11  ;;  %v1081_v3 = vld [vmem:[%s934_s9 + $0xd8] sm:$0xff]  ;;  %v1084_v4 = vld [vmem:[%s934_s9 + $0xe0] sm:$0xff]  ;;  %v533_v14 = vld [vmem:[%s1059_s14 + $0x8] sm:$0xff] }
  0x19   : > { %v442_v59 = vsub.f32 %v1021_v42, %v939_v11  ;;  %v443_v60 = vsub.f32 %v1024_v43, %v939_v11  ;;  %v1089_v5 = vld [vmem:[%s1315_s4] ss:$0 sm:$0xff]  ;;  %v534_v17 = vld [vmem:[%s1059_s14 + $0x10] sm:$0xff]  ;;  %v535_v18 = vld [vmem:[%s1059_s14 + $0x18] sm:$0xff]  ;;  %v1318_v42 = vsub.f32 %v1027_v44, %v939_v11 }
  0x1a   : > { %v532_v12 = vld [vmem:[%s1059_s14] sm:$0xff]  ;;  %v537_v7 = vld [vmem:[%s1059_s14 + $0x28] sm:$0xff]  ;;  %v538_v6 = vld [vmem:[%s1059_s14 + $0x30] sm:$0xff] }
  0x1b   : > { %v539_v2 = vld [vmem:[%s1059_s14 + $0x38] sm:$0xff]  ;;  %v542_v19 = vld [vmem:[%s1059_s14 + $0x50] sm:$0xff] }
  0x1c   : > { %v543_v20 = vld [vmem:[%s1059_s14 + $0x58] sm:$0xff]  ;;  %v550_v35 = vld [vmem:[%s1059_s14 + $0x90] sm:$0xff] }
  0x1d   : > { %v551_v36 = vld [vmem:[%s1059_s14 + $0x98] sm:$0xff] }
  0x22   : > { %v844_v45 = vpop.eup %843 }
  0x23   : > { %v416_v52 = vmul.f32 %v844_v45, %v413_v21  ;;  %v536_v45 = vld [vmem:[%s1059_s14 + $0x20] sm:$0xff] }
  0x25   : > { %v1072_v63 = vrot.slane %v416_v52, %v420_v9 }
  0x27   : > { %v461_v10 = vmul.f32 %v1072_v63, %v423_v25  ;;  %v462_v13 = vmul.f32 %v1072_v63, %v424_v26  ;;  %v463_v15 = vmul.f32 %v1072_v63, %v425_v27  ;;  %v464_v16 = vmul.f32 %v1072_v63, %v426_v31 }
  0x28   : > { %v465_v21 = vmul.f32 %v1072_v63, %v427_v32  ;;  %v466_v52 = vmul.f32 %v1072_v63, %v428_v33  ;;  %v467_v25 = vmul.f32 %v1072_v63, %v429_v34  ;;  %v468_v9 = vmul.f32 %v1072_v63, %v430_v38 }
  0x29   : > { %v500_v26 = vadd.f32 %v1089_v5, %v461_v10  ;;  %v501_v8 = vadd.f32 %v1089_v5, %v462_v13  ;;  %v502_v27 = vadd.f32 %v1089_v5, %v463_v15  ;;  %v503_v31 = vadd.f32 %v1089_v5, %v464_v16 }
  0x2a   : > { %v504_v32 = vadd.f32 %v1089_v5, %v465_v21  ;;  %v505_v33 = vadd.f32 %v1089_v5, %v466_v52  ;;  %v506_v34 = vadd.f32 %v1089_v5, %v467_v25  ;;  %v507_v38 = vadd.f32 %v1089_v5, %v468_v9 }
  0x2b   : > { %v564_v1 = vadd.f32 %v532_v12, %v500_v26  ;;  %v565_v0 = vadd.f32 %v533_v14, %v501_v8  ;;  %v566_v10 = vadd.f32 %v534_v17, %v502_v27  ;;  %v567_v61 = vadd.f32 %v535_v18, %v503_v31  ;;  %v547_v26 = vld [vmem:[%s1059_s14 + $0x78] sm:$0xff] }
  0x2c   : > { %v568_v13 = vadd.f32 %v536_v45, %v504_v32  ;;  %v569_v15 = vadd.f32 %v537_v7, %v505_v33  ;;  %v570_v16 = vadd.f32 %v538_v6, %v506_v34  ;;  %v571_v21 = vadd.f32 %v539_v2, %v507_v38  ;;  %v541_v2 = vld [vmem:[%s1059_s14 + $0x48] sm:$0xff] }
  0x2d   : > { %v596_v9 = vmax.f32 %v564_v1, 0.0  ;;  %v597_v12 = vmax.f32 %v565_v0, 0.0  ;;  %v598_v8 = vmax.f32 %v566_v10, 0.0  ;;  %v599_v14 = vmax.f32 %v567_v61, 0.0  ;;  %v540_v61 = vld [vmem:[%s1059_s14 + $0x40] sm:$0xff]  ;;  %v545_v45 = vld [vmem:[%s1059_s14 + $0x68] sm:$0xff] }
  0x2e   : > { %v600_v17 = vmax.f32 %v568_v13, 0.0  ;;  %v601_v18 = vmax.f32 %v569_v15, 0.0  ;;  %v602_v52 = vmax.f32 %v570_v16, 0.0  ;;  %v603_v25 = vmax.f32 %v571_v21, 0.0 }
  0x2f   : > { %628 = vst [vmem:[%s1127_s19] sm:$0xff] %v596_v9  ;;  %629 = vst [vmem:[%s1127_s19 + $0x8] sm:$0xff] %v597_v12  ;;  %v469_v0 = vmul.f32 %v1072_v63, %v431_v39  ;;  %v470_v1 = vmul.f32 %v1072_v63, %v432_v40  ;;  %v471_v6 = vmul.f32 %v1072_v63, %v433_v41  ;;  %v544_v39 = vld [vmem:[%s1059_s14 + $0x60] sm:$0xff] }
  0x30   : > { %630 = vst [vmem:[%s1127_s19 + $0x10] sm:$0xff] %v598_v8  ;;  %631 = vst [vmem:[%s1127_s19 + $0x18] sm:$0xff] %v599_v14  ;;  %v472_v7 = vmul.f32 %v1072_v63, %v434_v46  ;;  %v473_v22 = vmul.f32 %v1072_v63, %v435_v47  ;;  %v474_v23 = vmul.f32 %v1072_v63, %v436_v48  ;;  %v546_v48 = vld [vmem:[%s1059_s14 + $0x70] sm:$0xff] }
  0x31   : > { %632 = vst [vmem:[%s1127_s19 + $0x20] sm:$0xff] %v600_v17  ;;  %633 = vst [vmem:[%s1127_s19 + $0x28] sm:$0xff] %v601_v18  ;;  %v475_v40 = vmul.f32 %v1072_v63, %v437_v49  ;;  %v476_v41 = vmul.f32 %v1072_v63, %v438_v53  ;;  %v508_v24 = vadd.f32 %v1089_v5, %v469_v0  ;;  %v549_v0 = vld [vmem:[%s1059_s14 + $0x88] sm:$0xff] }
  0x32   : > { %634 = vst [vmem:[%s1127_s19 + $0x30] sm:$0xff] %v602_v52  ;;  %635 = vst [vmem:[%s1127_s19 + $0x38] sm:$0xff] %v603_v25  ;;  %v509_v46 = vadd.f32 %v1089_v5, %v470_v1  ;;  %v510_v47 = vadd.f32 %v1089_v5, %v471_v6  ;;  %v511_v28 = vadd.f32 %v1089_v5, %v472_v7  ;;  %v548_v52 = vld [vmem:[%s1059_s14 + $0x80] sm:$0xff] }
  0x33   : > { %v512_v29 = vadd.f32 %v1089_v5, %v473_v22  ;;  %v513_v49 = vadd.f32 %v1089_v5, %v474_v23  ;;  %v514_v27 = vadd.f32 %v1089_v5, %v475_v40  ;;  %v515_v30 = vadd.f32 %v1089_v5, %v476_v41  ;;  %v555_v22 = vld [vmem:[%s1059_s14 + $0xb8] sm:$0xff] }
  0x34   : > { %v572_v53 = vadd.f32 %v540_v61, %v508_v24  ;;  %v573_v31 = vadd.f32 %v541_v2, %v509_v46  ;;  %v574_v32 = vadd.f32 %v542_v19, %v510_v47  ;;  %v575_v33 = vadd.f32 %v543_v20, %v511_v28  ;;  %v553_v19 = vld [vmem:[%s1059_s14 + $0xa8] sm:$0xff]  ;;  %v554_v20 = vld [vmem:[%s1059_s14 + $0xb0] sm:$0xff] }
  0x35   : > { %v576_v34 = vadd.f32 %v544_v39, %v512_v29  ;;  %v577_v38 = vadd.f32 %v545_v45, %v513_v49  ;;  %v578_v10 = vadd.f32 %v546_v48, %v514_v27  ;;  %v579_v13 = vadd.f32 %v547_v26, %v515_v30  ;;  %v404_v26 = vld [vmem:[%s934_s9 + $0xe8] sm:$0xff] }
  0x36   : > { %v604_v15 = vmax.f32 %v572_v53, 0.0  ;;  %v605_v16 = vmax.f32 %v573_v31, 0.0  ;;  %v606_v21 = vmax.f32 %v574_v32, 0.0  ;;  %v607_v9 = vmax.f32 %v575_v33, 0.0  ;;  %v405_v53 = vld [vmem:[%s934_s9 + $0xf0] sm:$0xff]  ;;  %v406_v31 = vld [vmem:[%s934_s9 + $0xf8] sm:$0xff] }
  0x37   : > { %v608_v12 = vmax.f32 %v576_v34, 0.0  ;;  %v609_v8 = vmax.f32 %v577_v38, 0.0  ;;  %v610_v14 = vmax.f32 %v578_v10, 0.0  ;;  %v611_v17 = vmax.f32 %v579_v13, 0.0 }
  0x38   : > { %636 = vst [vmem:[%s1127_s19 + $0x40] sm:$0xff] %v604_v15  ;;  %637 = vst [vmem:[%s1127_s19 + $0x48] sm:$0xff] %v605_v16  ;;  %v477_v18 = vmul.f32 %v1072_v63, %v439_v54  ;;  %v478_v25 = vmul.f32 %v1072_v63, %v440_v55  ;;  %v479_v61 = vmul.f32 %v1072_v63, %v441_v58  ;;  %v552_v54 = vld [vmem:[%s1059_s14 + $0xa0] sm:$0xff] }
  0x39   : > { %638 = vst [vmem:[%s1127_s19 + $0x50] sm:$0xff] %v606_v21  ;;  %639 = vst [vmem:[%s1127_s19 + $0x58] sm:$0xff] %v607_v9  ;;  %v480_v1 = vmul.f32 %v1072_v63, %v442_v59  ;;  %v481_v37 = vmul.f32 %v1072_v63, %v443_v60  ;;  %v482_v55 = vmul.f32 %v1072_v63, %v1318_v42  ;;  %v556_v15 = vld [vmem:[%s1059_s14 + $0xc0] sm:$0xff] }
  0x3a   : > { %640 = vst [vmem:[%s1127_s19 + $0x60] sm:$0xff] %v608_v12  ;;  %641 = vst [vmem:[%s1127_s19 + $0x68] sm:$0xff] %v609_v8  ;;  %v1319_v58 = vsub.f32 %v1038_v50, %v939_v11  ;;  %v1320_v2 = vsub.f32 %v1041_v51, %v939_v11  ;;  %v516_v43 = vadd.f32 %v1089_v5, %v477_v18 }
  0x3b   : > { %642 = vst [vmem:[%s1127_s19 + $0x70] sm:$0xff] %v610_v14  ;;  %643 = vst [vmem:[%s1127_s19 + $0x78] sm:$0xff] %v611_v17  ;;  %v517_v60 = vadd.f32 %v1089_v5, %v478_v25  ;;  %v518_v7 = vadd.f32 %v1089_v5, %v479_v61  ;;  %v519_v44 = vadd.f32 %v1089_v5, %v480_v1  ;;  %v558_v17 = vld [vmem:[%s1059_s14 + $0xd0] sm:$0xff] }
  0x3c   : > { %v483_v59 = vmul.f32 %v1072_v63, %v1319_v58  ;;  %v484_v6 = vmul.f32 %v1072_v63, %v1320_v2  ;;  %v520_v50 = vadd.f32 %v1089_v5, %v481_v37  ;;  %v521_v39 = vadd.f32 %v1089_v5, %v482_v55  ;;  %v561_v2 = vld [vmem:[%s1059_s14 + $0xe8] sm:$0xff] }
  0x3d   : > { %v580_v40 = vadd.f32 %v548_v52, %v516_v43  ;;  %v581_v41 = vadd.f32 %v549_v0, %v517_v60  ;;  %v582_v24 = vadd.f32 %v550_v35, %v518_v7  ;;  %v583_v46 = vadd.f32 %v551_v36, %v519_v44  ;;  %v563_v43 = vld [vmem:[%s1059_s14 + $0xf8] sm:$0xff] }
  0x3e   : > { %v522_v51 = vadd.f32 %v1089_v5, %v483_v59  ;;  %v523_v23 = vadd.f32 %v1089_v5, %v484_v6  ;;  %v584_v47 = vadd.f32 %v552_v54, %v520_v50  ;;  %v585_v28 = vadd.f32 %v553_v19, %v521_v39  ;;  %v562_v6 = vld [vmem:[%s1059_s14 + $0xf0] sm:$0xff] }
  0x3f   : > { %v612_v29 = vmax.f32 %v580_v40, 0.0  ;;  %v613_v49 = vmax.f32 %v581_v41, 0.0  ;;  %v614_v27 = vmax.f32 %v582_v24, 0.0  ;;  %v615_v30 = vmax.f32 %v583_v46, 0.0 }
  0x40   : > { %v586_v45 = vadd.f32 %v554_v20, %v522_v51  ;;  %v587_v48 = vadd.f32 %v555_v22, %v523_v23  ;;  %v616_v32 = vmax.f32 %v584_v47, 0.0  ;;  %v617_v33 = vmax.f32 %v585_v28, 0.0 }
  0x41   : > { %644 = vst [vmem:[%s1127_s19 + $0x80] sm:$0xff] %v612_v29  ;;  %645 = vst [vmem:[%s1127_s19 + $0x88] sm:$0xff] %v613_v49  ;;  %v1321_v10 = vsub.f32 %v1050_v56, %v939_v11  ;;  %v1322_v16 = vsub.f32 %v1053_v57, %v939_v11  ;;  %v1323_v9 = vsub.f32 %v1070_v62, %v939_v11  ;;  %v557_v56 = vld [vmem:[%s1059_s14 + $0xc8] sm:$0xff]  ;;  %v559_v57 = vld [vmem:[%s1059_s14 + $0xd8] sm:$0xff] }
  0x42   : > { %v618_v34 = vmax.f32 %v586_v45, 0.0  ;;  %v619_v38 = vmax.f32 %v587_v48, 0.0  ;;  %646 = vst [vmem:[%s1127_s19 + $0x90] sm:$0xff] %v614_v27  ;;  %647 = vst [vmem:[%s1127_s19 + $0x98] sm:$0xff] %v615_v30  ;;  %v1324_v8 = vsub.f32 %v1081_v3, %v939_v11  ;;  %v1325_v18 = vsub.f32 %v1084_v4, %v939_v11  ;;  %v560_v4 = vld [vmem:[%s1059_s14 + $0xe0] sm:$0xff] }
  0x43   : > { %v485_v13 = vmul.f32 %v1072_v63, %v1321_v10  ;;  %v486_v21 = vmul.f32 %v1072_v63, %v1322_v16  ;;  %v487_v12 = vmul.f32 %v1072_v63, %v1323_v9  ;;  %648 = vst [vmem:[%s1127_s19 + $0xa0] sm:$0xff] %v616_v32  ;;  %649 = vst [vmem:[%s1127_s19 + $0xa8] sm:$0xff] %v617_v33 }
  0x44   : > { %v488_v14 = vmul.f32 %v1072_v63, %v1324_v8  ;;  %650 = vst [vmem:[%s1127_s19 + $0xb0] sm:$0xff] %v618_v34  ;;  %651 = vst [vmem:[%s1127_s19 + $0xb8] sm:$0xff] %v619_v38  ;;  %v489_v62 = vmul.f32 %v1072_v63, %v1325_v18  ;;  %v452_v52 = vsub.f32 %v404_v26, %v939_v11 }
  0x45   : > { %v453_v3 = vsub.f32 %v405_v53, %v939_v11  ;;  %v454_v25 = vsub.f32 %v406_v31, %v939_v11  ;;  %v524_v0 = vadd.f32 %v1089_v5, %v485_v13  ;;  %v525_v61 = vadd.f32 %v1089_v5, %v486_v21 }
  0x46   : > { %v526_v1 = vadd.f32 %v1089_v5, %v487_v12  ;;  %v527_v35 = vadd.f32 %v1089_v5, %v488_v14  ;;  %v528_v36 = vadd.f32 %v1089_v5, %v489_v62  ;;  %v490_v37 = vmul.f32 %v1072_v63, %v452_v52 }
  0x47   : > { %v491_v54 = vmul.f32 %v1072_v63, %v453_v3  ;;  %v492_v42 = vmul.f32 %v1072_v63, %v454_v25  ;;  %v588_v55 = vadd.f32 %v556_v15, %v524_v0  ;;  %v589_v11 = vadd.f32 %v557_v56, %v525_v61 }
  0x48   : > { %v590_v58 = vadd.f32 %v558_v17, %v526_v1  ;;  %v591_v59 = vadd.f32 %v559_v57, %v527_v35  ;;  %v592_v60 = vadd.f32 %v560_v4, %v528_v36  ;;  %v529_v7 = vadd.f32 %v1089_v5, %v490_v37 }
  0x49   : > { %v530_v44 = vadd.f32 %v1089_v5, %v491_v54  ;;  %v531_v19 = vadd.f32 %v1089_v5, %v492_v42  ;;  %v620_v63 = vmax.f32 %v588_v55, 0.0  ;;  %v621_v20 = vmax.f32 %v589_v11, 0.0 }
  0x4a   : > { %v622_v22 = vmax.f32 %v590_v58, 0.0  ;;  %v623_v50 = vmax.f32 %v591_v59, 0.0  ;;  %v624_v39 = vmax.f32 %v592_v60, 0.0  ;;  %v593_v51 = vadd.f32 %v561_v2, %v529_v7 }
  0x4b   : > { %v594_v23 = vadd.f32 %v562_v6, %v530_v44  ;;  %v595_v40 = vadd.f32 %v563_v43, %v531_v19  ;;  %652 = vst [vmem:[%s1127_s19 + $0xc0] sm:$0xff] %v620_v63  ;;  %653 = vst [vmem:[%s1127_s19 + $0xc8] sm:$0xff] %v621_v20 }
  0x4c   : > { %654 = vst [vmem:[%s1127_s19 + $0xd0] sm:$0xff] %v622_v22  ;;  %655 = vst [vmem:[%s1127_s19 + $0xd8] sm:$0xff] %v623_v50  ;;  %v625_v41 = vmax.f32 %v593_v51, 0.0 }
  0x4d   : > { %656 = vst [vmem:[%s1127_s19 + $0xe0] sm:$0xff] %v624_v39  ;;  %v626_v24 = vmax.f32 %v594_v23, 0.0  ;;  %v627_v46 = vmax.f32 %v595_v40, 0.0 }
  0x4e   : > { %657 = vst [vmem:[%s1127_s19 + $0xe8] sm:$0xff] %v625_v41 }
  0x4f   : > { %658 = vst [vmem:[%s1127_s19 + $0xf0] sm:$0xff] %v626_v24  ;;  %659 = vst [vmem:[%s1127_s19 + $0xf8] sm:$0xff] %v627_v46 }
  0x50 PF: > { %s16_s23 = sadd.s32 1, %s867_s23   ;;  %s1326_s21 = smov %s863_s22 }
  0x51   : > { %p13_p5 = scmp.ge.s32.totalorder %s16_s23, 4   ;;  %s1327_s22 = smov %s1329_s24 }
  0x53   :  { %15 = sbr.rel (!%p13_p5) target bundleno = 2 (0x2), region = 89 }

</bundles_post_ra>
